<compile_context>
chip_gen: v7x
topology: tpu7x:2x2x1
jax: 0.10.0
libtpu: 0.0.40
codegen_flags: <defaults>
</compile_context>

<pallas_src>
import jax
import jax.numpy as jnp
from jax import lax
from jax.experimental import pallas as pl
from jax.experimental.pallas import tpu as pltpu

# ----------------------------- configuration -----------------------------
B, V, C, H, W = 2, 2, 3, 16, 16          # context_image: [b, v, c, h, w]
PS = 4                                    # patch size
HP, WP = H // PS, W // PS                 # patches per side
NP = HP * WP                              # patches per view
N = B * V * NP                            # total patches
PIN = C * PS * PS                         # patch embedding input dim
D = 128                                   # hidden dim
GPARAM = 14                               # per-gaussian raw params
GDIM = PS * PS * GPARAM                   # 224: gaussian-head output per patch
POSE_DIM = 11                             # 3 trans + 6d rot + 2 focal
HDIM = 256                                # padded combined head width (lane-dense)
NEAR, FAR = 0.01, 100.0
M = B * V * H * W                         # total gaussians (one per pixel)
GB = V * H * W                            # gaussians per scene
P = H * W                                 # pixels per rendered view
BV = B * V
KS = 8                                    # padded splat coefficient rank

# splat tiling (toy sizes; scale these at real resolution, halve GB_TILE on v7x)
P_TILE = 256                              # pixels per lane tile (multiple of 128)
GB_TILE = 256                             # gaussians per reduction step


def _full_spec(arr):
    return pl.BlockSpec(arr.shape, lambda *_, n=arr.ndim: (0,) * n)


# ----------------------------- Pallas kernels -----------------------------
def encoder_heads_kernel(x_ref, w0_ref, b0_ref, w1_ref, b1_ref, w2_ref, b2_ref,
                         wh_ref, bh_ref, out_ref):
    """Fused patch-embed + residual MLP + combined (gaussian | pose) head.

    bf16 operands on the MXU, f32 accumulation.  The feature map never leaves
    VMEM; the single output is lane-dense [N, 256].
    """
    x = x_ref[...]                                                   # bf16 [N, PIN]
    h = jax.nn.gelu(
        jnp.dot(x, w0_ref[...], preferred_element_type=jnp.float32) + b0_ref[...])
    h = h + jax.nn.gelu(
        jnp.dot(h.astype(jnp.bfloat16), w1_ref[...],
                preferred_element_type=jnp.float32) + b1_ref[...])
    h = h + jax.nn.gelu(
        jnp.dot(h.astype(jnp.bfloat16), w2_ref[...],
                preferred_element_type=jnp.float32) + b2_ref[...])
    out_ref[...] = (jnp.dot(h.astype(jnp.bfloat16), wh_ref[...],
                            preferred_element_type=jnp.float32) + bh_ref[...])


def splat_depth_kernel(bp_ref, coef_ref, gz1_ref, out_ref, acc_ref):
    """Opacity-weighted depth splat, tiled over (view, pixel-tile, gaussian-tile).

    Pixels live on the lane axis.  Per grid step:
        logw[g, p] = sum_k coef[k, g] * bp[k, p]     (f32 MXU, KS contraction)
        w          = exp(logw)                       (EUP)  -> bf16
        acc       += gz1[:, g] @ w                   (bf16 MXU, f32 acc)
    The gaussian axis is the last grid axis ("arbitrary"); acc (VMEM scratch)
    holds [depth_sum; weight_sum; pad...] across it.  Final step normalizes
    with an exact divide.
    """
    kg = pl.program_id(2)

    @pl.when(kg == 0)
    def _():
        acc_ref[...] = jnp.zeros_like(acc_ref)

    logw = lax.dot_general(
        coef_ref[0], bp_ref[...],
        dimension_numbers=(((0,), (0,)), ((), ())),
        preferred_element_type=jnp.float32)                       # [GB_TILE, P_TILE]
    w = jnp.exp(logw).astype(jnp.bfloat16)                        # logw <= 0 by constr.
    acc_ref[...] += jnp.dot(gz1_ref[0], w,
                            preferred_element_type=jnp.float32)   # [KS, P_TILE]

    @pl.when(kg == pl.num_programs(2) - 1)
    def _():
        out_ref[0] = acc_ref[0:1, :] / (acc_ref[1:2, :] + 1e-6)   # [1, P_TILE]


# ----------------------------- JAX glue -----------------------------
def init_params(key):
    ks = jax.random.split(key, 8)
    wg = jax.random.normal(ks[3], (D, GDIM), jnp.float32) * 0.05
    wp = jax.random.normal(ks[4], (D, POSE_DIM), jnp.float32) * 0.05
    wh = jnp.concatenate(
        [wg, wp, jnp.zeros((D, HDIM - GDIM - POSE_DIM), jnp.float32)], axis=1)
    bh = jnp.zeros((1, HDIM), jnp.float32)
    p = {
        "w0": (jax.random.normal(ks[0], (PIN, D), jnp.float32) * 0.05
               ).astype(jnp.bfloat16),
        "b0": jnp.zeros((1, D), jnp.float32),
        "w1": (jax.random.normal(ks[1], (D, D), jnp.float32) * 0.05
               ).astype(jnp.bfloat16),
        "b1": jnp.zeros((1, D), jnp.float32),
        "w2": (jax.random.normal(ks[2], (D, D), jnp.float32) * 0.05
               ).astype(jnp.bfloat16),
        "b2": jnp.zeros((1, D), jnp.float32),
        "wh": wh.astype(jnp.bfloat16),
        "bh": bh,
    }
    return p


def rot6d_to_matrix(r6):
    a1, a2 = r6[..., :3], r6[..., 3:6]
    b1 = a1 / (jnp.linalg.norm(a1, axis=-1, keepdims=True) + 1e-8)
    a2p = a2 - jnp.sum(b1 * a2, axis=-1, keepdims=True) * b1
    b2 = a2p / (jnp.linalg.norm(a2p, axis=-1, keepdims=True) + 1e-8)
    b3 = jnp.cross(b1, b2)
    return jnp.stack([b1, b2, b3], axis=-1)     # columns are basis vectors (c2w)


@jax.jit
def anysplat_forward(context_image, params):
    # --- patchify ([b,v,c,h,w] NCHW -> patch-major rows) ---
    x = context_image.astype(jnp.float32)
    patches = x.reshape(B, V, C, HP, PS, WP, PS)
    patches = patches.transpose(0, 1, 3, 5, 2, 4, 6).reshape(N, PIN)
    patches_bf16 = patches.astype(jnp.bfloat16)

    # --- fused encoder + pose head + gaussian head (single Pallas call) ---
    enc_args = (patches_bf16, params["w0"], params["b0"], params["w1"],
                params["b1"], params["w2"], params["b2"], params["wh"],
                params["bh"])
    enc_flops = 2 * N * (PIN * D + 2 * D * D + D * HDIM)
    enc_bytes = (N * PIN * 2 + (PIN * D + 2 * D * D + D * HDIM) * 2
                 + (3 * D + HDIM) * 4 + N * HDIM * 4)
    raw_head = pl.pallas_call(
        encoder_heads_kernel,
        out_shape=jax.ShapeDtypeStruct((N, HDIM), jnp.float32),
        in_specs=[_full_spec(a) for a in enc_args],
        out_specs=pl.BlockSpec((N, HDIM), lambda *_: (0, 0)),
        cost_estimate=pl.CostEstimate(flops=enc_flops,
                                      transcendentals=3 * N * D,
                                      bytes_accessed=enc_bytes),
    )(*enc_args)
    # TODO(synk): at production patch counts, add a "parallel" grid axis over N
    # with row blocks >=128 (v5e) / >=256 (v6e/v7x) and constant weight blocks.

    # pose: mean-pool over patches commutes with the linear head, so the
    # per-patch pose columns are simply averaged per view here (tiny XLA op).
    pose = raw_head[:, GDIM:GDIM + POSE_DIM].reshape(BV, NP, POSE_DIM).mean(axis=1)

    trans = jnp.tanh(pose[:, 0:3]) * 2.0                                  # [BV,3]
    r6 = pose[:, 3:9] * 0.1 + jnp.array([1, 0, 0, 0, 1, 0], jnp.float32)
    rot = rot6d_to_matrix(r6)                                             # [BV,3,3]
    focal = 0.8 + 0.5 * jax.nn.sigmoid(pose[:, 9:11])                     # fx, fy

    extrinsic = jnp.zeros((BV, 4, 4), jnp.float32)
    extrinsic = extrinsic.at[:, :3, :3].set(rot)
    extrinsic = extrinsic.at[:, :3, 3].set(trans)
    extrinsic = extrinsic.at[:, 3, 3].set(1.0).reshape(B, V, 4, 4)
    intrinsic = jnp.zeros((BV, 3, 3), jnp.float32)
    intrinsic = intrinsic.at[:, 0, 0].set(focal[:, 0])
    intrinsic = intrinsic.at[:, 1, 1].set(focal[:, 1])
    intrinsic = intrinsic.at[:, 0, 2].set(0.5)
    intrinsic = intrinsic.at[:, 1, 2].set(0.5)
    intrinsic = intrinsic.at[:, 2, 2].set(1.0).reshape(B, V, 3, 3)

    # per-pixel raw params: [M, 14]  (patch-major -> pixel-major; ~57 KB)
    raw_px = raw_head[:, :GDIM].reshape(B, V, HP, WP, PS, PS, GPARAM)
    raw_px = raw_px.transpose(0, 1, 2, 4, 3, 5, 6).reshape(M, GPARAM)

    # ray directions from predicted intrinsics
    ys, xs = jnp.meshgrid(jnp.arange(H, dtype=jnp.float32),
                          jnp.arange(W, dtype=jnp.float32), indexing="ij")
    u = (xs + 0.5) / W
    vv = (ys + 0.5) / H
    fx = intrinsic[..., 0, 0][..., None, None]
    fy = intrinsic[..., 1, 1][..., None, None]
    dirs = jnp.stack([(u[None, None] - 0.5) / fx,
                      (vv[None, None] - 0.5) / fy,
                      jnp.ones((B, V, H, W), jnp.float32)], axis=-1)
    dirs = dirs / jnp.linalg.norm(dirs, axis=-1, keepdims=True)
    dirs_flat = dirs.reshape(M, 3)

    # --- gaussian activations (plain XLA; lane-sparse & negligible compute) ---
    sig = jax.nn.sigmoid
    depth_g = NEAR + sig(raw_px[:, 0:1]) * (FAR - NEAR)                  # [M,1]
    means_cam = dirs_flat * depth_g                                      # [M,3]
    scales = 1e-3 + sig(raw_px[:, 1:4]) * 0.3                            # [M,3]
    q = raw_px[:, 4:8] + jnp.array([1.0, 0.0, 0.0, 0.0], jnp.float32)
    rotations = q * jax.lax.rsqrt(jnp.sum(q * q, axis=-1, keepdims=True) + 1e-8)
    opac = sig(raw_px[:, 8:9])                                           # [M,1]
    colors = sig(raw_px[:, 9:12])                                        # [M,3]

    # camera -> world (predicted poses)
    means_cam_bv = means_cam.reshape(B, V, H * W, 3)
    R = extrinsic[..., :3, :3]
    T = extrinsic[..., :3, 3]
    means_world = jnp.einsum("bvij,bvnj->bvni", R, means_cam_bv) + T[:, :, None, :]

    # --- decoder: project gaussians into every context view of the same scene ---
    mw = means_world.reshape(B, GB, 3)
    rel = mw[:, None, :, :] - T[:, :, None, :]                    # [b, v_t, Gb, 3]
    p_cam = jnp.einsum("bvji,bvgj->bvgi", R, rel)                 # world -> cam (R^T)
    z = p_cam[..., 2]
    z_safe = jnp.where(jnp.abs(z) < 1e-3, 1e-3, z)
    fx2 = intrinsic[..., 0, 0][..., None]
    fy2 = intrinsic[..., 1, 1][..., None]
    gx = (fx2 * p_cam[..., 0] / z_safe + 0.5) * W                 # [b, v_t, Gb]
    gy = (fy2 * p_cam[..., 1] / z_safe + 0.5) * H
    scale_mean = scales.reshape(B, GB, 3).mean(-1)                # [b, Gb]
    sigma = scale_mean[:, None, :] * fx2 * W / jnp.maximum(z, 0.05) + 0.5
    opac_bv = jnp.broadcast_to(opac.reshape(B, 1, GB), (B, V, GB))

    # --- build lane-dense splat inputs (pixels on lanes, MXU-friendly) ---
    gx = gx.reshape(BV, GB)
    gy = gy.reshape(BV, GB)
    gz = z.reshape(BV, GB)
    sg = sigma.reshape(BV, GB)
    op_eff = opac_bv.reshape(BV, GB) * (gz > 0.05).astype(jnp.float32)

    inv2s2 = 1.0 / (2.0 * sg * sg + 1e-6)                         # exact
    log_op = jnp.log(jnp.maximum(op_eff, 1e-30))
    a0 = -inv2s2
    a1 = 2.0 * inv2s2 * gx
    a2 = 2.0 * inv2s2 * gy
    a3 = log_op - inv2s2 * (gx * gx + gy * gy)
    zg = jnp.zeros_like(a0)
    # lane-dense coefficient layout: [BV, KS, GB] (KS=8 on the sublane axis)
    coef = jnp.stack([a0, a1, a2, a3, zg, zg, zg, zg], axis=1)    # f32 [BV, KS, GB]
    gz1 = jnp.stack([gz, jnp.ones_like(gz), zg, zg, zg, zg, zg, zg],
                    axis=1).astype(jnp.bfloat16)                  # bf16 [BV, KS, GB]

    px = xs.reshape(-1) + 0.5                                     # [P]
    py = ys.reshape(-1) + 0.5
    onesp = jnp.ones_like(px)
    zp = jnp.zeros_like(px)
    bp = jnp.stack([px * px + py * py, px, py, onesp, zp, zp, zp, zp],
                   axis=0)                                        # f32 [KS, P]

    n_ptiles = P // P_TILE
    n_gtiles = GB // GB_TILE
    splat_flops = 4 * BV * KS * GB * P          # two KS-deep matmuls per view
    splat_bytes = (KS * P * 4 + BV * KS * GB * (4 + 2) + BV * P * 4)
    depth = pl.pallas_call(
        splat_depth_kernel,
        out_shape=jax.ShapeDtypeStruct((BV, 1, P), jnp.float32),
        grid=(BV, n_ptiles, n_gtiles),
        in_specs=[
            pl.BlockSpec((KS, P_TILE), lambda v, p, g: (0, p)),
            pl.BlockSpec((1, KS, GB_TILE), lambda v, p, g: (v, 0, g)),
            pl.BlockSpec((1, KS, GB_TILE), lambda v, p, g: (v, 0, g)),
        ],
        out_specs=pl.BlockSpec((1, 1, P_TILE), lambda v, p, g: (v, 0, p)),
        scratch_shapes=[pltpu.VMEM((KS, P_TILE), jnp.float32)],
        compiler_params=pltpu.CompilerParams(
            dimension_semantics=("parallel", "parallel", "arbitrary"),
            vmem_limit_bytes=32 * 1024 * 1024),
        cost_estimate=pl.CostEstimate(flops=splat_flops,
                                      transcendentals=BV * GB * P,
                                      bytes_accessed=splat_bytes),
    )(bp, coef, gz1)
    depth_map = depth.reshape(B, V, H, W)

    encoder_output = {
        "gaussians": {
            "means": means_world.reshape(B, V, H * W, 3),
            "scales": scales.reshape(B, V, H * W, 3),
            "rotations": rotations.reshape(B, V, H * W, 4),
            "opacities": opac.reshape(B, V, H * W, 1),
            "colors": colors.reshape(B, V, H * W, 3),
        },
        "pred_context_pose": {"extrinsic": extrinsic, "intrinsic": intrinsic},
    }
    decoder_output = {"depth": depth_map,
                      "near": jnp.full((1, V), NEAR, jnp.float32),
                      "far": jnp.full((1, V), FAR, jnp.float32)}
    return encoder_output, decoder_output


if __name__ == "__main__":
    key = jax.random.PRNGKey(0)
    k_img, k_par = jax.random.split(key)
    context_image = jax.random.uniform(k_img, (B, V, C, H, W), jnp.float32)
    params = init_params(k_par)

    enc_out, dec_out = anysplat_forward(context_image, params)
    jax.block_until_ready((enc_out, dec_out))

    assert enc_out["gaussians"]["means"].shape == (B, V, H * W, 3)
    assert enc_out["gaussians"]["rotations"].shape == (B, V, H * W, 4)
    assert enc_out["pred_context_pose"]["extrinsic"].shape == (B, V, 4, 4)
    assert enc_out["pred_context_pose"]["intrinsic"].shape == (B, V, 3, 3)
    assert dec_out["depth"].shape == (B, V, H, W)
    assert bool(jnp.all(jnp.isfinite(dec_out["depth"])))
    print("KERNEL_OK")
</pallas_src>

<mosaic_0001>
module attributes {stable_mosaic.version = 11 : i64} {
  func.func @encoder_heads_kernel(%arg0: memref<64x48xbf16, #tpu.memory_space<vmem>>, %arg1: memref<48x128xbf16, #tpu.memory_space<vmem>>, %arg2: memref<1x128xf32, #tpu.memory_space<vmem>>, %arg3: memref<128x128xbf16, #tpu.memory_space<vmem>>, %arg4: memref<1x128xf32, #tpu.memory_space<vmem>>, %arg5: memref<128x128xbf16, #tpu.memory_space<vmem>>, %arg6: memref<1x128xf32, #tpu.memory_space<vmem>>, %arg7: memref<128x256xbf16, #tpu.memory_space<vmem>>, %arg8: memref<1x256xf32, #tpu.memory_space<vmem>>, %arg9: memref<64x256xf32, #tpu.memory_space<vmem>>) attributes {dimension_semantics = [], scalar_prefetch = 0 : i64, scratch_operands = 0 : i64, tpu.core_type = #tpu.core_type<tc>} {
    %c0 = arith.constant 0 : index
    %c0_0 = arith.constant 0 : index
    %0 = vector.load %arg0[%c0, %c0_0] : memref<64x48xbf16, #tpu.memory_space<vmem>>, vector<64x48xbf16>
    %c0_1 = arith.constant 0 : index
    %c0_2 = arith.constant 0 : index
    %1 = vector.load %arg1[%c0_1, %c0_2] : memref<48x128xbf16, #tpu.memory_space<vmem>>, vector<48x128xbf16>
    %cst = arith.constant dense<0.000000e+00> : vector<64x128xf32>
    %2 = tpu.matmul %0, %1, %cst {dimension_numbers = #tpu.dot_dimension_numbers<[1], [0], [0], [1], [0, 0, 1, 1], [], []>} : vector<64x48xbf16>, vector<48x128xbf16>, vector<64x128xf32> -> vector<64x128xf32>
    %c0_3 = arith.constant 0 : index
    %c0_4 = arith.constant 0 : index
    %3 = vector.load %arg2[%c0_3, %c0_4] : memref<1x128xf32, #tpu.memory_space<vmem>>, vector<1x128xf32>
    %4 = vector.broadcast %3 : vector<1x128xf32> to vector<64x128xf32>
    %5 = arith.addf %2, %4 : vector<64x128xf32>
    %6 = arith.mulf %5, %5 : vector<64x128xf32>
    %7 = arith.mulf %5, %6 : vector<64x128xf32>
    %cst_5 = arith.constant 4.471500e-02 : f32
    %8 = vector.broadcast %cst_5 : f32 to vector<64x128xf32>
    %9 = arith.mulf %8, %7 : vector<64x128xf32>
    %10 = arith.addf %5, %9 : vector<64x128xf32>
    %cst_6 = arith.constant 0.797884583 : f32
    %11 = vector.broadcast %cst_6 : f32 to vector<64x128xf32>
    %12 = arith.mulf %11, %10 : vector<64x128xf32>
    %13 = math.tanh %12 : vector<64x128xf32>
    %cst_7 = arith.constant 1.000000e+00 : f32
    %14 = vector.broadcast %cst_7 : f32 to vector<64x128xf32>
    %15 = arith.addf %14, %13 : vector<64x128xf32>
    %cst_8 = arith.constant 5.000000e-01 : f32
    %16 = vector.broadcast %cst_8 : f32 to vector<64x128xf32>
    %17 = arith.mulf %16, %15 : vector<64x128xf32>
    %18 = arith.mulf %5, %17 : vector<64x128xf32>
    %19 = arith.truncf %18 : vector<64x128xf32> to vector<64x128xbf16>
    %c0_9 = arith.constant 0 : index
    %c0_10 = arith.constant 0 : index
    %20 = vector.load %arg3[%c0_9, %c0_10] : memref<128x128xbf16, #tpu.memory_space<vmem>>, vector<128x128xbf16>
    %cst_11 = arith.constant dense<0.000000e+00> : vector<64x128xf32>
    %21 = tpu.matmul %19, %20, %cst_11 {dimension_numbers = #tpu.dot_dimension_numbers<[1], [0], [0], [1], [0, 0, 1, 1], [], []>} : vector<64x128xbf16>, vector<128x128xbf16>, vector<64x128xf32> -> vector<64x128xf32>
    %c0_12 = arith.constant 0 : index
    %c0_13 = arith.constant 0 : index
    %22 = vector.load %arg4[%c0_12, %c0_13] : memref<1x128xf32, #tpu.memory_space<vmem>>, vector<1x128xf32>
    %23 = vector.broadcast %22 : vector<1x128xf32> to vector<64x128xf32>
    %24 = arith.addf %21, %23 : vector<64x128xf32>
    %25 = arith.mulf %24, %24 : vector<64x128xf32>
    %26 = arith.mulf %24, %25 : vector<64x128xf32>
    %cst_14 = arith.constant 4.471500e-02 : f32
    %27 = vector.broadcast %cst_14 : f32 to vector<64x128xf32>
    %28 = arith.mulf %27, %26 : vector<64x128xf32>
    %29 = arith.addf %24, %28 : vector<64x128xf32>
    %cst_15 = arith.constant 0.797884583 : f32
    %30 = vector.broadcast %cst_15 : f32 to vector<64x128xf32>
    %31 = arith.mulf %30, %29 : vector<64x128xf32>
    %32 = math.tanh %31 : vector<64x128xf32>
    %cst_16 = arith.constant 1.000000e+00 : f32
    %33 = vector.broadcast %cst_16 : f32 to vector<64x128xf32>
    %34 = arith.addf %33, %32 : vector<64x128xf32>
    %cst_17 = arith.constant 5.000000e-01 : f32
    %35 = vector.broadcast %cst_17 : f32 to vector<64x128xf32>
    %36 = arith.mulf %35, %34 : vector<64x128xf32>
    %37 = arith.mulf %24, %36 : vector<64x128xf32>
    %38 = arith.addf %18, %37 : vector<64x128xf32>
    %39 = arith.truncf %38 : vector<64x128xf32> to vector<64x128xbf16>
    %c0_18 = arith.constant 0 : index
    %c0_19 = arith.constant 0 : index
    %40 = vector.load %arg5[%c0_18, %c0_19] : memref<128x128xbf16, #tpu.memory_space<vmem>>, vector<128x128xbf16>
    %cst_20 = arith.constant dense<0.000000e+00> : vector<64x128xf32>
    %41 = tpu.matmul %39, %40, %cst_20 {dimension_numbers = #tpu.dot_dimension_numbers<[1], [0], [0], [1], [0, 0, 1, 1], [], []>} : vector<64x128xbf16>, vector<128x128xbf16>, vector<64x128xf32> -> vector<64x128xf32>
    %c0_21 = arith.constant 0 : index
    %c0_22 = arith.constant 0 : index
    %42 = vector.load %arg6[%c0_21, %c0_22] : memref<1x128xf32, #tpu.memory_space<vmem>>, vector<1x128xf32>
    %43 = vector.broadcast %42 : vector<1x128xf32> to vector<64x128xf32>
    %44 = arith.addf %41, %43 : vector<64x128xf32>
    %45 = arith.mulf %44, %44 : vector<64x128xf32>
    %46 = arith.mulf %44, %45 : vector<64x128xf32>
    %cst_23 = arith.constant 4.471500e-02 : f32
    %47 = vector.broadcast %cst_23 : f32 to vector<64x128xf32>
    %48 = arith.mulf %47, %46 : vector<64x128xf32>
    %49 = arith.addf %44, %48 : vector<64x128xf32>
    %cst_24 = arith.constant 0.797884583 : f32
    %50 = vector.broadcast %cst_24 : f32 to vector<64x128xf32>
    %51 = arith.mulf %50, %49 : vector<64x128xf32>
    %52 = math.tanh %51 : vector<64x128xf32>
    %cst_25 = arith.constant 1.000000e+00 : f32
    %53 = vector.broadcast %cst_25 : f32 to vector<64x128xf32>
    %54 = arith.addf %53, %52 : vector<64x128xf32>
    %cst_26 = arith.constant 5.000000e-01 : f32
    %55 = vector.broadcast %cst_26 : f32 to vector<64x128xf32>
    %56 = arith.mulf %55, %54 : vector<64x128xf32>
    %57 = arith.mulf %44, %56 : vector<64x128xf32>
    %58 = arith.addf %38, %57 : vector<64x128xf32>
    %59 = arith.truncf %58 : vector<64x128xf32> to vector<64x128xbf16>
    %c0_27 = arith.constant 0 : index
    %c0_28 = arith.constant 0 : index
    %60 = vector.load %arg7[%c0_27, %c0_28] : memref<128x256xbf16, #tpu.memory_space<vmem>>, vector<128x256xbf16>
    %cst_29 = arith.constant dense<0.000000e+00> : vector<64x256xf32>
    %61 = tpu.matmul %59, %60, %cst_29 {dimension_numbers = #tpu.dot_dimension_numbers<[1], [0], [0], [1], [0, 0, 1, 1], [], []>} : vector<64x128xbf16>, vector<128x256xbf16>, vector<64x256xf32> -> vector<64x256xf32>
    %c0_30 = arith.constant 0 : index
    %c0_31 = arith.constant 0 : index
    %62 = vector.load %arg8[%c0_30, %c0_31] : memref<1x256xf32, #tpu.memory_space<vmem>>, vector<1x256xf32>
    %63 = vector.broadcast %62 : vector<1x256xf32> to vector<64x256xf32>
    %64 = arith.addf %61, %63 : vector<64x256xf32>
    %c0_32 = arith.constant 0 : index
    %c0_33 = arith.constant 0 : index
    %65 = vector.load %arg9[%c0_32, %c0_33] : memref<64x256xf32, #tpu.memory_space<vmem>>, vector<64x256xf32>
    tpu.vector_store %arg9[%c0_32, %c0_33], %64 {strides = array<i32>} : memref<64x256xf32, #tpu.memory_space<vmem>>, vector<64x256xf32>,
    return
  }
}

module attributes {stable_mosaic.version = 11 : i64} {
  func.func @splat_depth_kernel(%arg0: i32, %arg1: i32, %arg2: i32, %arg3: memref<8x256xf32, #tpu.memory_space<vmem>>, %arg4: memref<1x8x256xf32, #tpu.memory_space<vmem>>, %arg5: memref<1x8x256xbf16, #tpu.memory_space<vmem>>, %arg6: memref<1x1x256xf32, #tpu.memory_space<vmem>>, %arg7: memref<8x256xf32, #tpu.memory_space<vmem>>) attributes {dimension_semantics = [#tpu.dimension_semantics<parallel>, #tpu.dimension_semantics<parallel>, #tpu.dimension_semantics<arbitrary>], iteration_bounds = array<i64: 4, 1, 2>, scalar_prefetch = 0 : i64, scratch_operands = 1 : i64, tpu.core_type = #tpu.core_type<tc>, window_params = [{transform_indices = @transform_0, window_bounds = array<i64: 8, 256>}, {transform_indices = @transform_1, window_bounds = array<i64: 1, 8, 256>}, {transform_indices = @transform_2, window_bounds = array<i64: 1, 8, 256>}, {transform_indices = @transform_3, window_bounds = array<i64: 1, 1, 256>}]} {
    %c0_i32 = arith.constant 0 : i32
    %0 = arith.cmpi eq, %arg2, %c0_i32 : i32
    %1 = arith.extui %0 : i1 to i32
    %c0_i32_0 = arith.constant 0 : i32
    %2 = arith.cmpi ne, %1, %c0_i32_0 : i32
    scf.if %2 {
      %cst_14 = arith.constant 0.000000e+00 : f32
      %18 = vector.broadcast %cst_14 : f32 to vector<8x256xf32>
      %c0_15 = arith.constant 0 : index
      %c0_16 = arith.constant 0 : index
      %19 = vector.load %arg7[%c0_15, %c0_16] : memref<8x256xf32, #tpu.memory_space<vmem>>, vector<8x256xf32>
      tpu.vector_store %arg7[%c0_15, %c0_16], %18 {strides = array<i32>} : memref<8x256xf32, #tpu.memory_space<vmem>>, vector<8x256xf32>,
    } else {
    }
    %c0 = arith.constant 0 : index
    %c0_1 = arith.constant 0 : index
    %c0_2 = arith.constant 0 : index
    %3 = vector.load %arg4[%c0, %c0_1, %c0_2] : memref<1x8x256xf32, #tpu.memory_space<vmem>>, vector<1x8x256xf32>
    %4 = vector.shape_cast %3 : vector<1x8x256xf32> to vector<8x256xf32>
    %c0_3 = arith.constant 0 : index
    %c0_4 = arith.constant 0 : index
    %5 = vector.load %arg3[%c0_3, %c0_4] : memref<8x256xf32, #tpu.memory_space<vmem>>, vector<8x256xf32>
    %cst = arith.constant dense<0.000000e+00> : vector<256x256xf32>
    %6 = tpu.matmul %4, %5, %cst {dimension_numbers = #tpu.dot_dimension_numbers<[0], [0], [1], [1], [0, 1, 1, 1], [], []>} : vector<8x256xf32>, vector<8x256xf32>, vector<256x256xf32> -> vector<256x256xf32>
    %7 = math.exp %6 : vector<256x256xf32>
    %8 = arith.truncf %7 : vector<256x256xf32> to vector<256x256xbf16>
    %c0_5 = arith.constant 0 : index
    %c0_6 = arith.constant 0 : index
    %9 = vector.load %arg7[%c0_5, %c0_6] : memref<8x256xf32, #tpu.memory_space<vmem>>, vector<8x256xf32>
    %c0_7 = arith.constant 0 : index
    %c0_8 = arith.constant 0 : index
    %c0_9 = arith.constant 0 : index
    %10 = vector.load %arg5[%c0_7, %c0_8, %c0_9] : memref<1x8x256xbf16, #tpu.memory_space<vmem>>, vector<1x8x256xbf16>
    %11 = vector.shape_cast %10 : vector<1x8x256xbf16> to vector<8x256xbf16>
    %cst_10 = arith.constant dense<0.000000e+00> : vector<8x256xf32>
    %12 = tpu.matmul %11, %8, %cst_10 {dimension_numbers = #tpu.dot_dimension_numbers<[1], [0], [0], [1], [0, 0, 1, 1], [], []>} : vector<8x256xbf16>, vector<256x256xbf16>, vector<8x256xf32> -> vector<8x256xf32>
    %13 = arith.addf %9, %12 : vector<8x256xf32>
    %c0_11 = arith.constant 0 : index
    %c0_12 = arith.constant 0 : index
    %14 = vector.load %arg7[%c0_11, %c0_12] : memref<8x256xf32, #tpu.memory_space<vmem>>, vector<8x256xf32>
    tpu.vector_store %arg7[%c0_11, %c0_12], %13 {strides = array<i32>} : memref<8x256xf32, #tpu.memory_space<vmem>>, vector<8x256xf32>,
    %c1_i32 = arith.constant 1 : i32
    %15 = arith.cmpi eq, %arg2, %c1_i32 : i32
    %16 = arith.extui %15 : i1 to i32
    %c0_i32_13 = arith.constant 0 : i32
    %17 = arith.cmpi ne, %16, %c0_i32_13 : i32
    scf.if %17 {
      %c0_14 = arith.constant 0 : index
      %c0_15 = arith.constant 0 : index
      %18 = vector.load %arg7[%c0_14, %c0_15] : memref<8x256xf32, #tpu.memory_space<vmem>>, vector<1x256xf32>
      %c1 = arith.constant 1 : index
      %c0_16 = arith.constant 0 : index
      %19 = vector.load %arg7[%c1, %c0_16] : memref<8x256xf32, #tpu.memory_space<vmem>>, vector<1x256xf32>
      %cst_17 = arith.constant 9.99999997E-7 : f32
      %20 = vector.broadcast %cst_17 : f32 to vector<1x256xf32>
      %21 = arith.addf %19, %20 : vector<1x256xf32>
      %22 = arith.divf %18, %21 : vector<1x256xf32>
      %c0_18 = arith.constant 0 : index
      %c0_19 = arith.constant 0 : index
      %c0_20 = arith.constant 0 : index
      %23 = vector.load %arg6[%c0_18, %c0_19, %c0_20] : memref<1x1x256xf32, #tpu.memory_space<vmem>>, vector<1x1x256xf32>
      %24 = vector.shape_cast %23 : vector<1x1x256xf32> to vector<1x256xf32>
      %25 = vector.shape_cast %22 : vector<1x256xf32> to vector<1x1x256xf32>
      tpu.vector_store %arg6[%c0_18, %c0_19, %c0_20], %25 {strides = array<i32>} : memref<1x1x256xf32, #tpu.memory_space<vmem>>, vector<1x1x256xf32>,
    } else {
    }
    return
  }
  func.func @transform_0(%arg0: i32, %arg1: i32, %arg2: i32) -> (i32, i32) {
    %c0_i32 = arith.constant 0 : i32
    %c0_i32_0 = arith.constant 0 : i32
    return %c0_i32, %arg1 : i32, i32
  }
  func.func @transform_1(%arg0: i32, %arg1: i32, %arg2: i32) -> (i32, i32, i32) {
    %c0_i32 = arith.constant 0 : i32
    %c0_i32_0 = arith.constant 0 : i32
    return %arg0, %c0_i32, %arg2 : i32, i32, i32
  }
  func.func @transform_2(%arg0: i32, %arg1: i32, %arg2: i32) -> (i32, i32, i32) {
    %c0_i32 = arith.constant 0 : i32
    %c0_i32_0 = arith.constant 0 : i32
    return %arg0, %c0_i32, %arg2 : i32, i32, i32
  }
  func.func @transform_3(%arg0: i32, %arg1: i32, %arg2: i32) -> (i32, i32, i32) {
    %c0_i32 = arith.constant 0 : i32
    %c0_i32_0 = arith.constant 0 : i32
    return %arg0, %c0_i32, %arg1 : i32, i32, i32
  }
}

</mosaic_0001>

<bundles_post_ra>
// kernel: anysplat_forward.2
= control target key start
LH: loop header
LB: loop body
LE: loop exit
PB: predicated region body
PF: predicated region fallthrough
CT: control target
= control target key end

     0   :  { %vm92_vm0 = vcmask 392192   ;;  %s1602_s1 = inlined_call_operand.vmem [shape: bf16[48,128], index: 1, kind: input, shape index: {}]   ;;  %s1603_s0 = inlined_call_operand.vmem [shape: bf16[64,48], index: 0, kind: input, shape index: {}]   ;;  %s1604_s3 = inlined_call_operand.vmem [shape: bf16[128,128], index: 3, kind: input, shape index: {}]   ;;  %s1605_s2 = inlined_call_operand.vmem [shape: f32[1,128], index: 2, kind: input, shape index: {}]   ;;  %s1606_s5 = inlined_call_operand.vmem [shape: bf16[128,128], index: 5, kind: input, shape index: {}]   ;;  %s1607_s4 = inlined_call_operand.vmem [shape: f32[1,128], index: 4, kind: input, shape index: {}]   ;;  %s1608_s7 = inlined_call_operand.vmem [shape: bf16[128,256], index: 7, kind: input, shape index: {}]   ;;  %s1609_s6 = inlined_call_operand.vmem [shape: f32[1,128], index: 6, kind: input, shape index: {}]   ;;  %s1610_s8 = inlined_call_operand.vmem [shape: f32[1,256], index: 8, kind: input, shape index: {}]   ;;  %s1611_s9 = inlined_call_operand.vmem [shape: f32[64,256], index: 9, kind: output, shape index: {}]  }
   0x1   :  { %v1043_v0 = vld [vmem:[%s1602_s1] sm:$0xff]   ;;  %v1044_v1 = vld [vmem:[%s1602_s1 + $0x8] sm:$0xff]   ;;  %v1045_v3 = vld [vmem:[%s1602_s1 + $0x10] sm:$0xff]  }
   0x2   :  { %964 = vmatprep.subr.bf16.mxu0 %v1043_v0  ;;  %v1046_v2 = vld [vmem:[%s1603_s0] sm:$0xff]   ;;  %v1047_v4 = vld [vmem:[%s1603_s0 + $0x8] sm:$0xff]   ;;  %v1048_v5 = vld [vmem:[%s1603_s0 + $0x10] sm:$0xff]  }
   0x3   :  { %965 = vmatpush3.bf16.msra.mxu0 %v1043_v0  ;;  %970 = vmatprep.mubr.msk.bf16.mxu0 %vm92_vm0, %v1046_v2  ;;  %v1049_v6 = vld [vmem:[%s1603_s0 + $0x18] sm:$0xff]   ;;  %v1050_v7 = vld [vmem:[%s1604_s3] sm:$0xff]   ;;  %v1051_v8 = vld [vmem:[%s1604_s3 + $0x8] sm:$0xff]  }
   0x4   :  { %966 = vmatprep.subr.bf16.mxu0 %v1044_v1  ;;  %978 = vmatprep.subr.bf16.mxu1 %v1050_v7  ;;  %v1052_v9 = vld [vmem:[%s1604_s3 + $0x10] sm:$0xff]   ;;  %v1053_v10 = vld [vmem:[%s1604_s3 + $0x18] sm:$0xff]   ;;  %v1054_v11 = vld [vmem:[%s1604_s3 + $0x20] sm:$0xff]  }
   0x5   :  { %979 = vmatpush3.bf16.msra.mxu1 %v1050_v7  ;;  %v1055_v12 = vld [vmem:[%s1604_s3 + $0x28] sm:$0xff]   ;;  %v1056_v13 = vld [vmem:[%s1604_s3 + $0x30] sm:$0xff]   ;;  %v1057_v14 = vld [vmem:[%s1604_s3 + $0x38] sm:$0xff]  }
   0x6   :  { %980 = vmatprep.subr.bf16.mxu1 %v1051_v8  ;;  %v887_v15 = vld [vmem:[%s1605_s2] ss:$0 sm:$0xff] }
   0x7   :  { %967 = vmatpush3.bf16.msra.mxu0 %v1044_v1 }
   0x8   :  { %968 = vmatprep.subr.bf16.mxu0 %v1045_v3 }
   0x9   :  { %981 = vmatpush3.bf16.msra.mxu1 %v1051_v8 }
   0xa   :  { %982 = vmatprep.subr.bf16.mxu1 %v1052_v9 }
   0xb   :  { %969 = vmatpush3.bf16.msra.mxu0 %v1045_v3 }
   0xd   :  { %983 = vmatpush3.bf16.msra.mxu1 %v1052_v9 }
   0xe   :  { %971 = vmatmul.mubr.msk.bf16.vlgmr.msra.gmra.mrb[0].mxu0 %vm92_vm0, %v1047_v4  ;;  %984 = vmatprep.subr.bf16.mxu1 %v1053_v10 }
   0xf   :  { %974 = vmatprep.mubr.msk.bf16.mxu0 %vm92_vm0, %v1048_v5 }
  0x11   :  { %985 = vmatpush3.bf16.msra.mxu1 %v1053_v10 }
  0x12   :  { %986 = vmatprep.subr.bf16.mxu1 %v1054_v11 }
  0x15   :  { %987 = vmatpush3.bf16.msra.mxu1 %v1054_v11 }
  0x16   :  { %975 = vmatmul.mubr.msk.bf16.gmra.mrb[4].mxu0 %vm92_vm0, %v1049_v6  ;;  %988 = vmatprep.subr.bf16.mxu1 %v1055_v12 }
  0x19   :  { %989 = vmatpush3.bf16.msra.mxu1 %v1055_v12 }
  0x1a   :  { %990 = vmatprep.subr.bf16.mxu1 %v1056_v13 }
  0x1d   :  { %991 = vmatpush3.bf16.msra.mxu1 %v1056_v13 }
  0x1e   :  { %992 = vmatprep.subr.bf16.mxu1 %v1057_v14 }
  0x21   :  { %993 = vmatpush3.bf16.msra.mxu1 %v1057_v14 }
  0xe1   :  { %v972_v16 = vpop.f32.mrb[0].mxu0 }
  0xe2   :  { %v1237_v17 = vadd.f32 %v972_v16, %v887_v15  ;;  %v139_v18 = vpop.f32.mrb[1].mxu0 }
  0xe3   :  { %v1239_v19 = vadd.f32 %v887_v15, %v139_v18  ;;  %v973_v20 = vpop.f32.mrb[2].mxu0 }
  0xe4   :  { %v172_v21 = vmul.f32 %v1237_v17, %v1237_v17  ;;  %v1243_v22 = vadd.f32 %v973_v20, %v887_v15  ;;  %v142_v23 = vpop.f32.mrb[3].mxu0 }
  0xe5   :  { %v170_v24 = vmul.f32 %v1239_v19, %v1239_v19  ;;  %v1247_v25 = vadd.f32 %v887_v15, %v142_v23 }
  0xe6   :  { %v180_v26 = vmul.f32 %v172_v21, %v1237_v17  ;;  %v173_v27 = vmul.f32 %v1243_v22, %v1243_v22 }
  0xe7   :  { %v178_v28 = vmul.f32 %v170_v24, %v1239_v19  ;;  %v171_v29 = vmul.f32 %v1247_v25, %v1247_v25 }
  0xe8   :  { %v188_v30 = vmul.f32 0.044715, %v180_v26  ;;  %v181_v31 = vmul.f32 %v173_v27, %v1243_v22 }
  0xe9   :  { %v186_v32 = vmul.f32 0.044715, %v178_v28  ;;  %v179_v33 = vmul.f32 %v171_v29, %v1247_v25  ;;  %v976_v34 = vpop.f32.mrb[4].mxu0 }
  0xea   :  { %v196_v35 = vadd.f32 %v188_v30, %v1237_v17  ;;  %v189_v36 = vmul.f32 0.044715, %v181_v31  ;;  %v1258_v37 = vadd.f32 %v976_v34, %v887_v15  ;;  %v155_v38 = vpop.f32.mrb[5].mxu0 }
  0xeb   :  { %v187_v39 = vmul.f32 0.044715, %v179_v33  ;;  %v1260_v40 = vadd.f32 %v887_v15, %v155_v38  ;;  %v977_v41 = vpop.f32.mrb[6].mxu0  ;;  %v194_v42 = vadd.f32 %v186_v32, %v1239_v19 }
  0xec   :  { %v204_v43 = vmul.f32 0.7978846, %v196_v35  ;;  %v197_v44 = vadd.f32 %v189_v36, %v1243_v22  ;;  %v176_v45 = vmul.f32 %v1258_v37, %v1258_v37  ;;  %v1266_v46 = vadd.f32 %v977_v41, %v887_v15  ;;  %v158_v47 = vpop.f32.mrb[7].mxu0 }
  0xed   :  { %v174_v48 = vmul.f32 %v1260_v40, %v1260_v40  ;;  %v1270_v49 = vadd.f32 %v887_v15, %v158_v47  ;;  %v195_v50 = vadd.f32 %v187_v39, %v1247_v25  ;;  %v202_v51 = vmul.f32 0.7978846, %v194_v42  ;;  %v1061_v47 = vld [vmem:[%s1606_s5 + $0x18] sm:$0xff]  }
  0xee   :  { %1090 = vtanh.f32 %v204_v43  ;;  %v205_v52 = vmul.f32 0.7978846, %v197_v44  ;;  %v184_v53 = vmul.f32 %v176_v45, %v1258_v37  ;;  %v177_v54 = vmul.f32 %v1266_v46, %v1266_v46 }
  0xef   :  { %v182_v55 = vmul.f32 %v174_v48, %v1260_v40  ;;  %v175_v56 = vmul.f32 %v1270_v49, %v1270_v49  ;;  %v203_v57 = vmul.f32 0.7978846, %v195_v50  ;;  %1092 = vtanh.f32 %v202_v51  ;;  %v1062_v48 = vld [vmem:[%s1606_s5 + $0x20] sm:$0xff]   ;;  %v1064_v50 = vld [vmem:[%s1606_s5 + $0x30] sm:$0xff]   ;;  %v1065_v51 = vld [vmem:[%s1606_s5 + $0x38] sm:$0xff]  }
  0xf0   :  { %1094 = vtanh.f32 %v205_v52  ;;  %v192_v58 = vmul.f32 0.044715, %v184_v53  ;;  %v185_v59 = vmul.f32 %v177_v54, %v1266_v46  ;;  %v899_v52 = vld [vmem:[%s1607_s4] ss:$0 sm:$0xff] }
  0xf1   :  { %v190_v60 = vmul.f32 0.044715, %v182_v55  ;;  %v183_v61 = vmul.f32 %v175_v56, %v1270_v49  ;;  %1096 = vtanh.f32 %v203_v57 }
  0xf2   :  { %v200_v62 = vadd.f32 %v192_v58, %v1258_v37  ;;  %v193_v63 = vmul.f32 0.044715, %v185_v59 }
  0xf3   :  { %v198_v0 = vadd.f32 %v190_v60, %v1260_v40  ;;  %v191_v1 = vmul.f32 0.044715, %v183_v61 }
  0xf4   :  { %v208_v2 = vmul.f32 0.7978846, %v200_v62  ;;  %v201_v3 = vadd.f32 %v193_v63, %v1266_v46 }
  0xf5   :  { %v206_v4 = vmul.f32 0.7978846, %v198_v0  ;;  %v199_v5 = vadd.f32 %v191_v1, %v1270_v49 }
  0xf6   :  { %1098 = vtanh.f32 %v208_v2  ;;  %v209_v6 = vmul.f32 0.7978846, %v201_v3 }
  0xf7   :  { %1100 = vtanh.f32 %v206_v4  ;;  %v207_v7 = vmul.f32 0.7978846, %v199_v5 }
  0xf8   :  { %v1091_v8 = vpop.eup %1090  ;;  %1102 = vtanh.f32 %v209_v6 }
  0xf9   :  { %v1093_v9 = vpop.eup %1092  ;;  %1104 = vtanh.f32 %v207_v7  ;;  %v220_v10 = vadd.f32 1.0, %v1091_v8 }
  0xfa   :  { %v1095_v11 = vpop.eup %1094  ;;  %v218_v12 = vadd.f32 1.0, %v1093_v9 }
  0xfb   :  { %v1097_v13 = vpop.eup %1096  ;;  %v221_v14 = vadd.f32 1.0, %v1095_v11  ;;  %v228_v18 = vmul.f32 0.5, %v220_v10 }
  0xfc   :  { %v219_v15 = vadd.f32 1.0, %v1097_v13  ;;  %v226_v16 = vmul.f32 0.5, %v218_v12 }
  0xfd   :  { %v229_v20 = vmul.f32 0.5, %v221_v14  ;;  %v1295_v29 = vmul.f32 %v228_v18, %v1237_v17 }
  0xfe   :  { %v227_v21 = vmul.f32 0.5, %v219_v15  ;;  %v1289_v26 = vmul.f32 %v226_v16, %v1239_v19 }
  0xff   :  { %v1286_v23 = vmul.f32 %v229_v20, %v1243_v22 }
 0x100   :  { %v1099_v24 = vpop.eup %1098  ;;  %v1292_v27 = vmul.f32 %v227_v21, %v1247_v25 }
 0x101   :  { %v1101_v28 = vpop.eup %1100  ;;  %v224_v30 = vadd.f32 1.0, %v1099_v24  ;;  %v243_v22 = vpack.c.bf16 %v1286_v23, %v1295_v29 }
 0x102   :  { %v1103_v31 = vpop.eup %1102  ;;  %v242_v32 = vpack.c.bf16 %v1292_v27, %v1289_v26  ;;  %v222_v33 = vadd.f32 1.0, %v1101_v28 }
 0x103   :  { %v1105_v34 = vpop.eup %1104  ;;  %v225_v35 = vadd.f32 1.0, %v1103_v31  ;;  %v232_v25 = vmul.f32 0.5, %v224_v30 }
 0x104   :  { %994 = vmatprep.mubr.bf16.mxu1 %v242_v32  ;;  %v223_v19 = vadd.f32 1.0, %v1105_v34  ;;  %v230_v36 = vmul.f32 0.5, %v222_v33 }
 0x105   :  { %995 = vmatmul.mubr.bf16.vlgmr.msra.gmra.mrb[0].mxu1 %v243_v22  ;;  %v233_v38 = vmul.f32 0.5, %v225_v35  ;;  %v1311_v43 = vmul.f32 %v232_v25, %v1258_v37  ;;  %v1060_v37 = vld [vmem:[%s1606_s5 + $0x10] sm:$0xff]  }
 0x106   :  { %v231_v39 = vmul.f32 0.5, %v223_v19  ;;  %v1305_v41 = vmul.f32 %v230_v36, %v1260_v40  ;;  %v1059_v40 = vld [vmem:[%s1606_s5 + $0x8] sm:$0xff]  }
 0x107   :  { %v1302_v17 = vmul.f32 %v233_v38, %v1266_v46  ;;  %v1058_v46 = vld [vmem:[%s1606_s5] sm:$0xff]  }
 0x108   :  { %v1308_v42 = vmul.f32 %v231_v39, %v1270_v49  ;;  %1002 = vmatprep.subr.bf16.mxu0 %v1058_v46  ;;  %v1063_v49 = vld [vmem:[%s1606_s5 + $0x28] sm:$0xff]  }
 0x109   :  { %v245_v45 = vpack.c.bf16 %v1302_v17, %v1311_v43  ;;  %1003 = vmatpush3.bf16.msra.mxu0 %v1058_v46 }
 0x10a   :  { %v244_v44 = vpack.c.bf16 %v1308_v42, %v1305_v41  ;;  %1004 = vmatprep.subr.bf16.mxu0 %v1059_v40 }
 0x10c   :  { %998 = vmatprep.mubr.bf16.mxu1 %v244_v44 }
 0x10d   :  { %999 = vmatmul.mubr.bf16.gmra.mrb[4].mxu1 %v245_v45  ;;  %1005 = vmatpush3.bf16.msra.mxu0 %v1059_v40 }
 0x10e   :  { %1006 = vmatprep.subr.bf16.mxu0 %v1060_v37 }
 0x111   :  { %1007 = vmatpush3.bf16.msra.mxu0 %v1060_v37 }
 0x112   :  { %1008 = vmatprep.subr.bf16.mxu0 %v1061_v47 }
 0x115   :  { %1009 = vmatpush3.bf16.msra.mxu0 %v1061_v47 }
 0x116   :  { %1010 = vmatprep.subr.bf16.mxu0 %v1062_v48 }
 0x119   :  { %1011 = vmatpush3.bf16.msra.mxu0 %v1062_v48 }
 0x11a   :  { %1012 = vmatprep.subr.bf16.mxu0 %v1063_v49 }
 0x11d   :  { %1013 = vmatpush3.bf16.msra.mxu0 %v1063_v49 }
 0x11e   :  { %1014 = vmatprep.subr.bf16.mxu0 %v1064_v50 }
 0x121   :  { %1015 = vmatpush3.bf16.msra.mxu0 %v1064_v50 }
 0x122   :  { %1016 = vmatprep.subr.bf16.mxu0 %v1065_v51 }
 0x125   :  { %1017 = vmatpush3.bf16.msra.mxu0 %v1065_v51 }
 0x1d8   :  { %v996_v53 = vpop.f32.mrb[0].mxu1 }
 0x1d9   :  { %v1344_v54 = vadd.f32 %v996_v53, %v899_v52  ;;  %v351_v55 = vpop.f32.mrb[1].mxu1 }
 0x1da   :  { %v1346_v56 = vadd.f32 %v899_v52, %v351_v55  ;;  %v997_v57 = vpop.f32.mrb[2].mxu1 }
 0x1db   :  { %v384_v58 = vmul.f32 %v1344_v54, %v1344_v54  ;;  %v1350_v59 = vadd.f32 %v997_v57, %v899_v52  ;;  %v354_v60 = vpop.f32.mrb[3].mxu1 }
 0x1dc   :  { %v382_v61 = vmul.f32 %v1346_v56, %v1346_v56  ;;  %v1354_v62 = vadd.f32 %v899_v52, %v354_v60 }
 0x1dd   :  { %v392_v63 = vmul.f32 %v384_v58, %v1344_v54  ;;  %v385_v0 = vmul.f32 %v1350_v59, %v1350_v59 }
 0x1de   :  { %v390_v1 = vmul.f32 %v382_v61, %v1346_v56  ;;  %v383_v2 = vmul.f32 %v1354_v62, %v1354_v62 }
 0x1df   :  { %v400_v3 = vmul.f32 0.044715, %v392_v63  ;;  %v393_v4 = vmul.f32 %v385_v0, %v1350_v59 }
 0x1e0   :  { %v398_v5 = vmul.f32 0.044715, %v390_v1  ;;  %v391_v6 = vmul.f32 %v383_v2, %v1354_v62  ;;  %v1000_v7 = vpop.f32.mrb[4].mxu1 }
 0x1e1   :  { %v408_v8 = vadd.f32 %v400_v3, %v1344_v54  ;;  %v401_v9 = vmul.f32 0.044715, %v393_v4  ;;  %v1365_v10 = vadd.f32 %v1000_v7, %v899_v52  ;;  %v367_v11 = vpop.f32.mrb[5].mxu1 }
 0x1e2   :  { %v406_v12 = vadd.f32 %v398_v5, %v1346_v56  ;;  %v399_v13 = vmul.f32 0.044715, %v391_v6  ;;  %v1368_v14 = vadd.f32 %v899_v52, %v367_v11  ;;  %v1001_v15 = vpop.f32.mrb[6].mxu1 }
 0x1e3   :  { %v416_v16 = vmul.f32 0.7978846, %v408_v8  ;;  %v409_v18 = vadd.f32 %v401_v9, %v1350_v59  ;;  %v388_v20 = vmul.f32 %v1365_v10, %v1365_v10  ;;  %v1373_v21 = vadd.f32 %v1001_v15, %v899_v52  ;;  %v370_v24 = vpop.f32.mrb[7].mxu1 }
 0x1e4   :  { %v414_v28 = vmul.f32 0.7978846, %v406_v12  ;;  %v407_v30 = vadd.f32 %v399_v13, %v1354_v62  ;;  %v386_v31 = vmul.f32 %v1368_v14, %v1368_v14  ;;  %v1378_v32 = vadd.f32 %v899_v52, %v370_v24 }
 0x1e5   :  { %1106 = vtanh.f32 %v416_v16  ;;  %v417_v33 = vmul.f32 0.7978846, %v409_v18  ;;  %v396_v34 = vmul.f32 %v388_v20, %v1365_v10  ;;  %v389_v22 = vmul.f32 %v1373_v21, %v1373_v21 }
 0x1e6   :  { %1108 = vtanh.f32 %v414_v28  ;;  %v415_v35 = vmul.f32 0.7978846, %v407_v30  ;;  %v394_v19 = vmul.f32 %v386_v31, %v1368_v14  ;;  %v387_v36 = vmul.f32 %v1378_v32, %v1378_v32 }
 0x1e7   :  { %1110 = vtanh.f32 %v417_v33  ;;  %v404_v25 = vmul.f32 0.044715, %v396_v34  ;;  %v397_v38 = vmul.f32 %v389_v22, %v1373_v21 }
 0x1e8   :  { %1112 = vtanh.f32 %v415_v35  ;;  %v402_v39 = vmul.f32 0.044715, %v394_v19  ;;  %v395_v44 = vmul.f32 %v387_v36, %v1378_v32 }
 0x1e9   :  { %v412_v45 = vadd.f32 %v404_v25, %v1365_v10  ;;  %v405_v46 = vmul.f32 0.044715, %v397_v38  ;;  %v1077_v25 = vld [vmem:[%s1608_s7 + $0x34] ss:$8 sps:$4 sm:$0xff]   ;;  %v1075_v38 = vld [vmem:[%s1608_s7 + $0x30] ss:$8 sps:$4 sm:$0xff]  }
 0x1ea   :  { %v410_v40 = vadd.f32 %v402_v39, %v1368_v14  ;;  %v403_v37 = vmul.f32 0.044715, %v395_v44  ;;  %v1080_v39 = vld [vmem:[%s1608_s7 + $0x44] ss:$8 sps:$4 sm:$0xff]   ;;  %v1078_v44 = vld [vmem:[%s1608_s7 + $0x40] ss:$8 sps:$4 sm:$0xff]  }
 0x1eb   :  { %v420_v47 = vmul.f32 0.7978846, %v412_v45  ;;  %v413_v48 = vadd.f32 %v405_v46, %v1373_v21  ;;  %v1083_v45 = vld [vmem:[%s1608_s7 + $0x54] ss:$8 sps:$4 sm:$0xff]   ;;  %v1081_v46 = vld [vmem:[%s1608_s7 + $0x50] ss:$8 sps:$4 sm:$0xff]  }
 0x1ec   :  { %v418_v49 = vmul.f32 0.7978846, %v410_v40  ;;  %v411_v50 = vadd.f32 %v403_v37, %v1378_v32  ;;  %v1086_v40 = vld [vmem:[%s1608_s7 + $0x64] ss:$8 sps:$4 sm:$0xff]   ;;  %v1084_v37 = vld [vmem:[%s1608_s7 + $0x60] ss:$8 sps:$4 sm:$0xff]  }
 0x1ed   :  { %1114 = vtanh.f32 %v420_v47  ;;  %v421_v51 = vmul.f32 0.7978846, %v413_v48  ;;  %v1089_v47 = vld [vmem:[%s1608_s7 + $0x74] ss:$8 sps:$4 sm:$0xff]   ;;  %v1087_v48 = vld [vmem:[%s1608_s7 + $0x70] ss:$8 sps:$4 sm:$0xff]  }
 0x1ee   :  { %1116 = vtanh.f32 %v418_v49  ;;  %v419_v52 = vmul.f32 0.7978846, %v411_v50  ;;  %v1138_v49 = vmov 0   ;;  %v908_v50 = vld [vmem:[%s1609_s6] ss:$0 sm:$0xff] }
 0x1ef   :  { %v1107_v53 = vpop.eup %1106  ;;  %1118 = vtanh.f32 %v421_v51  ;;  %836 = vmatprep.mubr.bf16.mxu1 %v1138_v49 }
 0x1f0   :  { %v1109_v55 = vpop.eup %1108  ;;  %v432_v57 = vadd.f32 1.0, %v1107_v53  ;;  %1120 = vtanh.f32 %v419_v52 }
 0x1f1   :  { %v1111_v58 = vpop.eup %1110  ;;  %v430_v60 = vadd.f32 1.0, %v1109_v55 }
 0x1f2   :  { %v1113_v61 = vpop.eup %1112  ;;  %v440_v63 = vmul.f32 0.5, %v432_v57  ;;  %v433_v0 = vadd.f32 1.0, %v1111_v58 }
 0x1f3   :  { %v431_v1 = vadd.f32 1.0, %v1113_v61  ;;  %v438_v2 = vmul.f32 0.5, %v430_v60 }
 0x1f4   :  { %v441_v3 = vmul.f32 0.5, %v433_v0  ;;  %v448_v6 = vmul.f32 %v440_v63, %v1344_v54 }
 0x1f5   :  { %v439_v4 = vmul.f32 0.5, %v431_v1  ;;  %v446_v5 = vmul.f32 %v438_v2, %v1346_v56 }
 0x1f6   :  { %v449_v7 = vmul.f32 %v441_v3, %v1350_v59  ;;  %v1406_v54 = vadd.f32 %v448_v6, %v1295_v29 }
 0x1f7   :  { %v1115_v8 = vpop.eup %1114  ;;  %v447_v9 = vmul.f32 %v439_v4, %v1354_v62  ;;  %v1400_v16 = vadd.f32 %v446_v5, %v1289_v26 }
 0x1f8   :  { %v1117_v11 = vpop.eup %1116  ;;  %v1397_v12 = vadd.f32 %v449_v7, %v1286_v23  ;;  %v436_v13 = vadd.f32 1.0, %v1115_v8 }
 0x1f9   :  { %v1119_v15 = vpop.eup %1118  ;;  %v1403_v18 = vadd.f32 %v447_v9, %v1292_v27  ;;  %v434_v56 = vadd.f32 1.0, %v1117_v11 }
 0x1fa   :  { %v1121_v20 = vpop.eup %1120  ;;  %v437_v59 = vadd.f32 1.0, %v1119_v15  ;;  %v444_v24 = vmul.f32 0.5, %v436_v13  ;;  %v463_v30 = vpack.c.bf16 %v1397_v12, %v1406_v54 }
 0x1fb   :  { %v462_v62 = vpack.c.bf16 %v1403_v18, %v1400_v16  ;;  %v435_v23 = vadd.f32 1.0, %v1121_v20  ;;  %v442_v28 = vmul.f32 0.5, %v434_v56 }
 0x1fc   :  { %v445_v26 = vmul.f32 0.5, %v437_v59  ;;  %v452_v33 = vmul.f32 %v444_v24, %v1365_v10 }
 0x1fd   :  { %1018 = vmatprep.mubr.bf16.mxu0 %v462_v62  ;;  %v443_v31 = vmul.f32 0.5, %v435_v23  ;;  %v450_v27 = vmul.f32 %v442_v28, %v1368_v14 }
 0x1fe   :  { %1019 = vmatmul.mubr.bf16.vlgmr.msra.gmra.mrb[8].mxu0 %v463_v30  ;;  %v453_v29 = vmul.f32 %v445_v26, %v1373_v21  ;;  %v1426_v36 = vadd.f32 %v452_v33, %v1311_v43  ;;  %v1069_v43 = vld [vmem:[%s1608_s7 + $0x10] ss:$8 sps:$4 sm:$0xff]   ;;  %v1074_v21 = vld [vmem:[%s1608_s7 + $0x24] ss:$8 sps:$4 sm:$0xff]  }
 0x1ff   :  { %v451_v34 = vmul.f32 %v443_v31, %v1378_v32  ;;  %v1420_v35 = vadd.f32 %v450_v27, %v1305_v41  ;;  %v1066_v41 = vld [vmem:[%s1608_s7] ss:$8 sps:$4 sm:$0xff]  }
 0x200   :  { %v1417_v22 = vadd.f32 %v453_v29, %v1302_v17  ;;  %v1068_v17 = vld [vmem:[%s1608_s7 + $0x4] ss:$8 sps:$4 sm:$0xff]   ;;  %v1072_v32 = vld [vmem:[%s1608_s7 + $0x20] ss:$8 sps:$4 sm:$0xff]  }
 0x201   :  { %v1423_v19 = vadd.f32 %v451_v34, %v1308_v42  ;;  %1026 = vmatprep.subr.bf16.mxu1 %v1068_v17  ;;  %794 = vmatprep.subr.bf16.mxu0 %v1068_v17  ;;  %v1071_v42 = vld [vmem:[%s1608_s7 + $0x14] ss:$8 sps:$4 sm:$0xff]  }
 0x202   :  { %v465_v10 = vpack.c.bf16 %v1417_v22, %v1426_v36  ;;  %1034 = vmatpush1.bf16.msra.mxu1 %v1066_v41  ;;  %795 = vmatpush1.bf16.msra.mxu0 %v1066_v41 }
 0x203   :  { %v464_v14 = vpack.c.bf16 %v1423_v19, %v1420_v35  ;;  %1027 = vmatprep.subr.bf16.mxu1 %v1071_v42  ;;  %796 = vmatprep.subr.bf16.mxu0 %v1071_v42 }
 0x205   :  { %1022 = vmatprep.mubr.bf16.mxu0 %v464_v14 }
 0x206   :  { %1023 = vmatmul.mubr.bf16.gmra.mrb[12].mxu0 %v465_v10  ;;  %1035 = vmatpush1.bf16.msra.mxu1 %v1069_v43 }
 0x207   :  { %797 = vmatpush1.bf16.msra.mxu0 %v1069_v43  ;;  %1028 = vmatprep.subr.bf16.mxu1 %v1074_v21 }
 0x208   :  { %798 = vmatprep.subr.bf16.mxu0 %v1074_v21  ;;  %826 = vmatprep.mubr.bf16.mxu0 %v1138_v49 }
 0x20a   :  { %1036 = vmatpush1.bf16.msra.mxu1 %v1072_v32 }
 0x20b   :  { %799 = vmatpush1.bf16.msra.mxu0 %v1072_v32  ;;  %1029 = vmatprep.subr.bf16.mxu1 %v1077_v25 }
 0x20c   :  { %800 = vmatprep.subr.bf16.mxu0 %v1077_v25 }
 0x20e   :  { %1037 = vmatpush1.bf16.msra.mxu1 %v1075_v38 }
 0x20f   :  { %801 = vmatpush1.bf16.msra.mxu0 %v1075_v38  ;;  %1030 = vmatprep.subr.bf16.mxu1 %v1080_v39 }
 0x210   :  { %802 = vmatprep.subr.bf16.mxu0 %v1080_v39 }
 0x212   :  { %1038 = vmatpush1.bf16.msra.mxu1 %v1078_v44 }
 0x213   :  { %803 = vmatpush1.bf16.msra.mxu0 %v1078_v44  ;;  %1031 = vmatprep.subr.bf16.mxu1 %v1083_v45 }
 0x214   :  { %804 = vmatprep.subr.bf16.mxu0 %v1083_v45 }
 0x216   :  { %1039 = vmatpush1.bf16.msra.mxu1 %v1081_v46 }
 0x217   :  { %805 = vmatpush1.bf16.msra.mxu0 %v1081_v46  ;;  %1032 = vmatprep.subr.bf16.mxu1 %v1086_v40 }
 0x218   :  { %806 = vmatprep.subr.bf16.mxu0 %v1086_v40 }
 0x21a   :  { %1040 = vmatpush1.bf16.msra.mxu1 %v1084_v37 }
 0x21b   :  { %807 = vmatpush1.bf16.msra.mxu0 %v1084_v37  ;;  %1033 = vmatprep.subr.bf16.mxu1 %v1089_v47 }
 0x21c   :  { %808 = vmatprep.subr.bf16.mxu0 %v1089_v47 }
 0x21e   :  { %1041 = vmatpush1.bf16.msra.mxu1 %v1087_v48 }
 0x21f   :  { %809 = vmatpush1.bf16.msra.mxu0 %v1087_v48 }
 0x2d1   :  { %v1020_v51 = vpop.f32.mrb[8].mxu0 }
 0x2d2   :  { %v1485_v52 = vadd.f32 %v1020_v51, %v908_v50  ;;  %v571_v53 = vpop.f32.mrb[9].mxu0 }
 0x2d3   :  { %v1487_v55 = vadd.f32 %v908_v50, %v571_v53  ;;  %v1021_v57 = vpop.f32.mrb[10].mxu0 }
 0x2d4   :  { %v604_v58 = vmul.f32 %v1485_v52, %v1485_v52  ;;  %v1491_v60 = vadd.f32 %v1021_v57, %v908_v50  ;;  %v574_v61 = vpop.f32.mrb[11].mxu0 }
 0x2d5   :  { %v602_v63 = vmul.f32 %v1487_v55, %v1487_v55  ;;  %v1495_v0 = vadd.f32 %v908_v50, %v574_v61 }
 0x2d6   :  { %v612_v1 = vmul.f32 %v604_v58, %v1485_v52  ;;  %v605_v2 = vmul.f32 %v1491_v60, %v1491_v60 }
 0x2d7   :  { %v610_v3 = vmul.f32 %v602_v63, %v1487_v55  ;;  %v603_v4 = vmul.f32 %v1495_v0, %v1495_v0 }
 0x2d8   :  { %v620_v5 = vmul.f32 0.044715, %v612_v1  ;;  %v613_v6 = vmul.f32 %v605_v2, %v1491_v60 }
 0x2d9   :  { %v618_v7 = vmul.f32 0.044715, %v610_v3  ;;  %v611_v8 = vmul.f32 %v603_v4, %v1495_v0  ;;  %v1024_v9 = vpop.f32.mrb[12].mxu0 }
 0x2da   :  { %v628_v11 = vadd.f32 %v620_v5, %v1485_v52  ;;  %v621_v13 = vmul.f32 0.044715, %v613_v6  ;;  %v1506_v15 = vadd.f32 %v1024_v9, %v908_v50  ;;  %v587_v56 = vpop.f32.mrb[13].mxu0 }
 0x2db   :  { %v626_v20 = vadd.f32 %v618_v7, %v1487_v55  ;;  %v619_v59 = vmul.f32 0.044715, %v611_v8  ;;  %v1509_v24 = vadd.f32 %v908_v50, %v587_v56  ;;  %v1025_v62 = vpop.f32.mrb[14].mxu0 }
 0x2dc   :  { %v636_v23 = vmul.f32 0.7978846, %v628_v11  ;;  %v629_v28 = vadd.f32 %v621_v13, %v1491_v60  ;;  %v608_v30 = vmul.f32 %v1506_v15, %v1506_v15  ;;  %v1514_v26 = vadd.f32 %v1025_v62, %v908_v50  ;;  %v590_v31 = vpop.f32.mrb[15].mxu0 }
 0x2dd   :  { %v634_v27 = vmul.f32 0.7978846, %v626_v20  ;;  %v627_v33 = vadd.f32 %v619_v59, %v1495_v0  ;;  %v606_v29 = vmul.f32 %v1509_v24, %v1509_v24  ;;  %v1519_v34 = vadd.f32 %v908_v50, %v590_v31 }
 0x2de   :  { %1122 = vtanh.f32 %v636_v23  ;;  %v637_v14 = vmul.f32 0.7978846, %v629_v28  ;;  %v616_v10 = vmul.f32 %v608_v30, %v1506_v15  ;;  %v609_v17 = vmul.f32 %v1514_v26, %v1514_v26 }
 0x2df   :  { %1124 = vtanh.f32 %v634_v27  ;;  %v635_v41 = vmul.f32 0.7978846, %v627_v33  ;;  %v614_v42 = vmul.f32 %v606_v29, %v1509_v24  ;;  %v607_v43 = vmul.f32 %v1519_v34, %v1519_v34 }
 0x2e0   :  { %1126 = vtanh.f32 %v637_v14  ;;  %v624_v21 = vmul.f32 0.044715, %v616_v10  ;;  %v617_v32 = vmul.f32 %v609_v17, %v1514_v26 }
 0x2e1   :  { %1128 = vtanh.f32 %v635_v41  ;;  %v622_v25 = vmul.f32 0.044715, %v614_v42  ;;  %v615_v38 = vmul.f32 %v607_v43, %v1519_v34 }
 0x2e2   :  { %v632_v39 = vadd.f32 %v624_v21, %v1506_v15  ;;  %v625_v44 = vmul.f32 0.044715, %v617_v32 }
 0x2e3   :  { %v630_v45 = vadd.f32 %v622_v25, %v1509_v24  ;;  %v623_v46 = vmul.f32 0.044715, %v615_v38  ;;  %v704_v25 = vlaneseq }
 0x2e4   :  { %v640_v40 = vmul.f32 0.7978846, %v632_v39  ;;  %v633_v37 = vadd.f32 %v625_v44, %v1514_v26 }
 0x2e5   :  { %v638_v47 = vmul.f32 0.7978846, %v630_v45  ;;  %v631_v48 = vadd.f32 %v623_v46, %v1519_v34 }
 0x2e6   :  { %1130 = vtanh.f32 %v640_v40  ;;  %v641_v50 = vmul.f32 0.7978846, %v633_v37 }
 0x2e7   :  { %1132 = vtanh.f32 %v638_v47  ;;  %v639_v51 = vmul.f32 0.7978846, %v631_v48 }
 0x2e8   :  { %v1123_v53 = vpop.eup %1122  ;;  %1134 = vtanh.f32 %v641_v50 }
 0x2e9   :  { %v1125_v57 = vpop.eup %1124  ;;  %v652_v58 = vadd.f32 1.0, %v1123_v53  ;;  %1136 = vtanh.f32 %v639_v51 }
 0x2ea   :  { %v1127_v61 = vpop.eup %1126  ;;  %v650_v63 = vadd.f32 1.0, %v1125_v57 }
 0x2eb   :  { %v1129_v1 = vpop.eup %1128  ;;  %v660_v2 = vmul.f32 0.5, %v652_v58  ;;  %v653_v3 = vadd.f32 1.0, %v1127_v61 }
 0x2ec   :  { %v658_v4 = vmul.f32 0.5, %v650_v63  ;;  %v651_v5 = vadd.f32 1.0, %v1129_v1 }
 0x2ed   :  { %v668_v6 = vmul.f32 %v660_v2, %v1485_v52  ;;  %v661_v7 = vmul.f32 0.5, %v653_v3 }
 0x2ee   :  { %v666_v8 = vmul.f32 %v658_v4, %v1487_v55  ;;  %v659_v9 = vmul.f32 0.5, %v651_v5 }
 0x2ef   :  { %v669_v11 = vmul.f32 %v661_v7, %v1491_v60  ;;  %v676_v59 = vadd.f32 %v668_v6, %v1406_v54 }
 0x2f0   :  { %v1131_v13 = vpop.eup %1130  ;;  %v667_v56 = vmul.f32 %v659_v9, %v1495_v0  ;;  %v674_v30 = vadd.f32 %v666_v8, %v1400_v16 }
 0x2f1   :  { %v1133_v20 = vpop.eup %1132  ;;  %v677_v62 = vadd.f32 %v669_v11, %v1397_v12  ;;  %v656_v23 = vadd.f32 1.0, %v1131_v13 }
 0x2f2   :  { %v1135_v28 = vpop.eup %1134  ;;  %v675_v52 = vadd.f32 %v667_v56, %v1403_v18  ;;  %v654_v31 = vadd.f32 1.0, %v1133_v20 }
 0x2f3   :  { %v1137_v27 = vpop.eup %1136  ;;  %v683_v55 = vpack.c.bf16 %v677_v62, %v676_v59  ;;  %v657_v33 = vadd.f32 1.0, %v1135_v28  ;;  %v664_v29 = vmul.f32 0.5, %v656_v23 }
 0x2f4   :  { %v682_v60 = vpack.c.bf16 %v675_v52, %v674_v30  ;;  %v655_v14 = vadd.f32 1.0, %v1137_v27  ;;  %v662_v10 = vmul.f32 0.5, %v654_v31 }
 0x2f5   :  { %837 = vmatmul.mubr.bf16.vlgmr.msra.gmra.mrb[8].mxu1 %v683_v55  ;;  %v665_v0 = vmul.f32 0.5, %v657_v33  ;;  %v672_v54 = vmul.f32 %v664_v29, %v1506_v15 }
 0x2f6   :  { %827 = vmatmul.mubr.bf16.vlgmr.msra.gmra.mrb[16].mxu0 %v682_v60  ;;  %846 = vmatprep.mubr.bf16.mxu1 %v1138_v49  ;;  %v663_v12 = vmul.f32 0.5, %v655_v14  ;;  %v670_v16 = vmul.f32 %v662_v10, %v1509_v24  ;;  %v705_v24 = vshrl.u32 %v704_v25, 7 }
 0x2f7   :  { %v673_v18 = vmul.f32 %v665_v0, %v1514_v26  ;;  %v680_v41 = vadd.f32 %v672_v54, %v1426_v36  ;;  %v702_v26 = vld [vmem:[%s1610_s8] sm:$0x3] }
 0x2f8   :  { %v671_v17 = vmul.f32 %v663_v12, %v1519_v34  ;;  %v678_v43 = vadd.f32 %v670_v16, %v1420_v35  ;;  %v706_v38 = vsub.s32 0, %v705_v24  ;;  %v710_v36 = vsub.s32 1, %v705_v24 }
 0x2f9   :  { %v681_v42 = vadd.f32 %v673_v18, %v1417_v22 }
 0x2fa   :  { %v679_v21 = vadd.f32 %v671_v17, %v1423_v19  ;;  %v707_v34 = vrot.slane %v702_v26, %v706_v38  ;;  %v711_v22 = vrot.slane %v702_v26, %v710_v36 }
 0x2fb   :  { %v685_v32 = vpack.c.bf16 %v681_v42, %v680_v41 }
 0x2fc   :  { %v684_v15 = vpack.c.bf16 %v679_v21, %v678_v43 }
 0x2fe   :  { %847 = vmatmul.mubr.bf16.gmra.mrb[12].mxu1 %v684_v15 }
 0x2ff   :  { %856 = vmatprep.mubr.bf16.mxu1 %v1138_v49 }
 0x306   :  { %857 = vmatmul.mubr.bf16.gmra.mrb[16].mxu1 %v685_v32 }
 0x3c8   :  { %v838_v39 = vpop.f32.mrb[8].mxu1 }
 0x3c9   :  { %v839_v35 = vadd.f32 %v838_v39, %v707_v34  ;;  %v828_v44 = vpop.f32.mrb[16].mxu0  ;;  %v840_v19 = vpop.f32.mrb[9].mxu1 }
 0x3ca   :  { %v829_v45 = vadd.f32 %v828_v44, %v707_v34  ;;  %v841_v46 = vadd.f32 %v840_v19, %v711_v22  ;;  %v830_v40 = vpop.f32.mrb[17].mxu0  ;;  %v842_v37 = vpop.f32.mrb[10].mxu1 }
 0x3cb   :  { %871 = vst [vmem:[%s1611_s9 + $0x20] sm:$0xff] %v839_v35  ;;  %v831_v49 = vadd.f32 %v830_v40, %v711_v22  ;;  %v843_v47 = vadd.f32 %v842_v37, %v707_v34  ;;  %v832_v48 = vpop.f32.mrb[18].mxu0  ;;  %v844_v50 = vpop.f32.mrb[11].mxu1 }
 0x3cc   :  { %867 = vst [vmem:[%s1611_s9] sm:$0xff] %v829_v45  ;;  %872 = vst [vmem:[%s1611_s9 + $0x28] sm:$0xff] %v841_v46  ;;  %v833_v51 = vadd.f32 %v832_v48, %v707_v34  ;;  %v845_v53 = vadd.f32 %v844_v50, %v711_v22  ;;  %v834_v57 = vpop.f32.mrb[19].mxu0 }
 0x3cd   :  { %868 = vst [vmem:[%s1611_s9 + $0x8] sm:$0xff] %v831_v49  ;;  %873 = vst [vmem:[%s1611_s9 + $0x30] sm:$0xff] %v843_v47  ;;  %v835_v58 = vadd.f32 %v834_v57, %v711_v22 }
 0x3ce   :  { %869 = vst [vmem:[%s1611_s9 + $0x10] sm:$0xff] %v833_v51  ;;  %874 = vst [vmem:[%s1611_s9 + $0x38] sm:$0xff] %v845_v53 }
 0x3cf   :  { %870 = vst [vmem:[%s1611_s9 + $0x18] sm:$0xff] %v835_v58 }
 0x3d1   :  { %v848_v61 = vpop.f32.mrb[12].mxu1 }
 0x3d2   :  { %v849_v63 = vadd.f32 %v848_v61, %v707_v34  ;;  %v850_v1 = vpop.f32.mrb[13].mxu1 }
 0x3d3   :  { %v851_v2 = vadd.f32 %v850_v1, %v711_v22  ;;  %v852_v3 = vpop.f32.mrb[14].mxu1 }
 0x3d4   :  { %875 = vst [vmem:[%s1611_s9 + $0x40] sm:$0xff] %v849_v63  ;;  %v853_v4 = vadd.f32 %v852_v3, %v707_v34  ;;  %v854_v5 = vpop.f32.mrb[15].mxu1 }
 0x3d5   :  { %876 = vst [vmem:[%s1611_s9 + $0x48] sm:$0xff] %v851_v2  ;;  %v855_v6 = vadd.f32 %v854_v5, %v711_v22 }
 0x3d6   :  { %877 = vst [vmem:[%s1611_s9 + $0x50] sm:$0xff] %v853_v4 }
 0x3d7   :  { %878 = vst [vmem:[%s1611_s9 + $0x58] sm:$0xff] %v855_v6 }
 0x3d9   :  { %v858_v7 = vpop.f32.mrb[16].mxu1 }
 0x3da   :  { %v859_v8 = vadd.f32 %v858_v7, %v707_v34  ;;  %v860_v9 = vpop.f32.mrb[17].mxu1 }
 0x3db   :  { %v861_v11 = vadd.f32 %v860_v9, %v711_v22  ;;  %v862_v13 = vpop.f32.mrb[18].mxu1 }
 0x3dc   :  { %879 = vst [vmem:[%s1611_s9 + $0x60] sm:$0xff] %v859_v8  ;;  %v863_v56 = vadd.f32 %v862_v13, %v707_v34  ;;  %v864_v20 = vpop.f32.mrb[19].mxu1 }
 0x3dd   :  { %880 = vst [vmem:[%s1611_s9 + $0x68] sm:$0xff] %v861_v11  ;;  %v865_v59 = vadd.f32 %v864_v20, %v711_v22 }
 0x3de   :  { %881 = vst [vmem:[%s1611_s9 + $0x70] sm:$0xff] %v863_v56 }
 0x3df   :  { %882 = vst [vmem:[%s1611_s9 + $0x78] sm:$0xff] %v865_v59 }

// kernel: anysplat_forward.3
= control target key start
LH: loop header
LB: loop body
LE: loop exit
PB: predicated region body
PF: predicated region fallthrough
CT: control target
= control target key end

     0   :  { %s1338_s12 = smov 0   ;;  %s1340_s13 = smov 0   ;;  %s1479_s0 = inlined_call_operand.vmem [shape: f32[8,256], index: 0, kind: input, shape index: {}]   ;;  %s1480_s1 = inlined_call_operand.vmem [shape: f32[4,8,512], index: 1, kind: input, shape index: {}]   ;;  %s1481_s2 = inlined_call_operand.vmem [shape: bf16[4,8,512], index: 2, kind: input, shape index: {}]   ;;  %s1482_s3 = inlined_call_operand.vmem [shape: f32[4,1,256], index: 3, kind: output, shape index: {}]  }
   0x1   :  { %s1342_s14 = smov 0   ;;  %s1344_s15 = smov 0  }
   0x2   :  { %s1346_s16 = smov 0  }
   0x3 LB: > { %s25_s17 = sadd.s32 1, %s1306_s14  ;;  %s32_s18 = sadd.s32 1, %s1310_s15  ;;  %s1314_s16 = sphi %s1346_s16, %s13_s16   ;;  %s1310_s15 = sphi %s1344_s15, %s1486_s15   ;;  %s1306_s14 = sphi %s1342_s14, %s1485_s14   ;;  %s1302_s13 = sphi %s1340_s13, %s1484_s13   ;;  %s1298_s12 = sphi %s1338_s12, %s1483_s12  }
   0x4   : > { %p26_p0 = scmp.ge.s32.totalorder %s25_s17, 2  ;;  %p1056_p1 = scmp.ge.s32.totalorder %s1314_s16, 1 }
   0x5   : > { %p193_p2 = scmp.lt.s32.totalorder %s1314_s16, 9 }
   0x6   : > { %s1488_s17 = smov (%p26_p0, %s25_s17), 0  ;;  %s1490_s18 = smov (!%p26_p0, %s32_s18), %s1310_s15 }
   0x7   : > { %p194_p3 = pnand %p1056_p1, %p193_p2  ;;  %p34_p4 = scmp.ge.s32.totalorder %s1490_s18, 4 }
   0x8   : > { %s1057_s19 = sshll.u32 (!%p194_p3), %s1298_s12, 1  ;;  %p245_p5 = scmp.lt.s32.totalorder (!%p194_p3), %s1302_s13, 3 }
   0x9   : > { %s1492_s18 = smov (%p34_p4, %s1490_s18), 0  ;;  %197 = sbr.rel (%p194_p3) target bundleno = 753 (0x2f1), region = 32 }
   0xa   : > { %p247_p6 = scmp.lt.s32.totalorder (!%p194_p3), %s1057_s19, 3  ;;  %p1064_p7 = scmp.ne.s32.totalorder (!%p194_p3), %s1298_s12, 0 }
  0x10   : > { %s1494_s13 = smov (!%p245_p5, %s1302_s13), 3  ;;  %s1496_s19 = smov (!%p247_p6, %s1057_s19), 3 }
  0x11   : > { %s1058_s20 = sshll.u32 %s1494_s13, 2  ;;  %s1063_s21 = sshll.u32 %s1494_s13, 1  ;;  %v1316_v0 = vmov (!%p1064_p7), 0.0  }
  0x12   : > { %s250_s22 = sadd.s32 %s1058_s20, %s1496_s19  ;;  %s1374_s25 = scalar_lea.vmem %s1482_s3, %s1063_s21  ;;  %277 = vst [vmem:[#allocation2] sm:$0xff] (!%p1064_p7), %v1316_v0  ;;  %278 = vst [vmem:[#allocation2 + $0x8] sm:$0xff] (!%p1064_p7), %v1316_v0 }
  0x13   : > { %s1059_s26 = sshll.u32 %s250_s22, 3  ;;  %s1062_s27 = sshll.u32 %s250_s22, 2 }
  0x14   : > { %s252_s30 = scalar_lea.vmem %s1480_s1, %s1059_s26  ;;  %s1382_s6 = scalar_lea.vmem %s1481_s2, %s1062_s27 }
  0x15   : > { %276 = sbr.rel (%p1064_p7) target bundleno = 28 (0x1c), region = 36 }
  0x1c PF: > { %v279_v1 = vld [vmem:[%s252_s30] sm:$0xff]  ;;  %v282_v2 = vld [vmem:[%s1479_s0 + $0x8] sm:$0xff]  ;;  %v1317_v4 = vmov 0.0   ;;  %vm347_vm0 = vcmask 64512   ;;  %p1099_p8 = scmp.ne.s32.totalorder %s1298_s12, 1 }
  0x1d   : > { %283 = vxpose.xlu0.b32.start.end [1/1] (short) %v279_v1, 128  ;;  %444 = vmatprep.subr.mxu0 %v282_v2  ;;  %v281_v3 = vld [vmem:[%s1479_s0] sm:$0xff]  ;;  %v280_v5 = vld [vmem:[%s252_s30 + $0x8] sm:$0xff] }
  0x1e   : > { %445 = vmatpush1.msra.mxu0 %v281_v3  ;;  %508 = vmatprep.mubr.f32.mxu0 %v1317_v4  ;;  %v1456_v53 = vld [vmem:[%s1382_s6] sm:$0xff] }
  0x1f   : > { %v1098_v55 = vcombine.high %v1456_v53, %v1456_v53 }
  0x21   : > { %903 = vmatprep.mubr.bf16.mxu1 %v1098_v55 }
  0x5a   : > { %315 = vxpose.xlu0.b32.start.end [1/1] (short) %v280_v5, 128 }
  0x9d   : > { %v299_v6 = vpop.trf.xlu0 }
  0x9e   : > { %1065 = vmatmul.mubr.msk.f32.vlgmr.msra.gmra.mrb[0].mxu0 %vm347_vm0, %v299_v6 }
  0x9f   : > { %514 = vmatprep.mubr.f32.mxu0 %v1317_v4 }
  0xa1   : > { %v300_v7 = vpop.trf.xlu0 }
  0xa2   : > { %1066 = vmatmul.mubr.msk.f32.gmra.mrb[2].mxu0 %vm347_vm0, %v300_v7 }
  0xa3   : > { %520 = vmatprep.mubr.f32.mxu0 %v1317_v4 }
  0xa5   : > { %v301_v8 = vpop.trf.xlu0 }
  0xa6   : > { %1067 = vmatmul.mubr.msk.f32.gmra.mrb[4].mxu0 %vm347_vm0, %v301_v8 }
  0xa7   : > { %526 = vmatprep.mubr.f32.mxu0 %v1317_v4 }
  0xa9   : > { %v302_v9 = vpop.trf.xlu0 }
  0xaa   : > { %1068 = vmatmul.mubr.msk.f32.gmra.mrb[6].mxu0 %vm347_vm0, %v302_v9 }
  0xab   : > { %532 = vmatprep.mubr.f32.mxu0 %v1317_v4 }
  0xad   : > { %v303_v10 = vpop.trf.xlu0 }
  0xae   : > { %1069 = vmatmul.mubr.msk.f32.gmra.mrb[8].mxu0 %vm347_vm0, %v303_v10 }
  0xaf   : > { %538 = vmatprep.mubr.f32.mxu0 %v1317_v4 }
  0xb1   : > { %v304_v11 = vpop.trf.xlu0 }
  0xb2   : > { %1070 = vmatmul.mubr.msk.f32.gmra.mrb[10].mxu0 %vm347_vm0, %v304_v11 }
  0xb3   : > { %544 = vmatprep.mubr.f32.mxu0 %v1317_v4 }
  0xb5   : > { %v305_v12 = vpop.trf.xlu0 }
  0xb6   : > { %1071 = vmatmul.mubr.msk.f32.gmra.mrb[12].mxu0 %vm347_vm0, %v305_v12 }
  0xb7   : > { %550 = vmatprep.mubr.f32.mxu0 %v1317_v4 }
  0xb9   : > { %v306_v13 = vpop.trf.xlu0 }
  0xba   : > { %1072 = vmatmul.mubr.msk.f32.gmra.mrb[14].mxu0 %vm347_vm0, %v306_v13 }
  0xbb   : > { %556 = vmatprep.mubr.f32.mxu0 %v1317_v4 }
  0xbd   : > { %v307_v14 = vpop.trf.xlu0 }
  0xbe   : > { %1073 = vmatmul.mubr.msk.f32.gmra.mrb[16].mxu0 %vm347_vm0, %v307_v14 }
  0xbf   : > { %562 = vmatprep.mubr.f32.mxu0 %v1317_v4 }
  0xc1   : > { %v308_v15 = vpop.trf.xlu0 }
  0xc2   : > { %1074 = vmatmul.mubr.msk.f32.gmra.mrb[18].mxu0 %vm347_vm0, %v308_v15 }
  0xc3   : > { %568 = vmatprep.mubr.f32.mxu0 %v1317_v4 }
  0xc5   : > { %v309_v16 = vpop.trf.xlu0 }
  0xc6   : > { %1075 = vmatmul.mubr.msk.f32.gmra.mrb[20].mxu0 %vm347_vm0, %v309_v16 }
  0xc7   : > { %574 = vmatprep.mubr.f32.mxu0 %v1317_v4 }
  0xc9   : > { %v310_v17 = vpop.trf.xlu0 }
  0xca   : > { %1076 = vmatmul.mubr.msk.f32.gmra.mrb[22].mxu0 %vm347_vm0, %v310_v17 }
  0xcb   : > { %580 = vmatprep.mubr.f32.mxu0 %v1317_v4 }
  0xcd   : > { %v311_v18 = vpop.trf.xlu0 }
  0xce   : > { %1077 = vmatmul.mubr.msk.f32.gmra.mrb[24].mxu0 %vm347_vm0, %v311_v18 }
  0xcf   : > { %586 = vmatprep.mubr.f32.mxu0 %v1317_v4 }
  0xd1   : > { %v312_v19 = vpop.trf.xlu0 }
  0xd2   : > { %1078 = vmatmul.mubr.msk.f32.gmra.mrb[26].mxu0 %vm347_vm0, %v312_v19 }
  0xd3   : > { %592 = vmatprep.mubr.f32.mxu0 %v1317_v4 }
  0xd5   : > { %v313_v20 = vpop.trf.xlu0 }
  0xd6   : > { %1079 = vmatmul.mubr.msk.f32.gmra.mrb[28].mxu0 %vm347_vm0, %v313_v20 }
  0xd7   : > { %598 = vmatprep.mubr.f32.mxu0 %v1317_v4 }
  0xd9   : > { %v314_v21 = vpop.trf.xlu0 }
  0xda   : > { %1080 = vmatmul.mubr.msk.f32.gmra.mrb[30].mxu0 %vm347_vm0, %v314_v21 }
  0xdb   : > { %604 = vmatprep.mubr.f32.mxu0 %v1317_v4 }
  0xdd   : > { %v331_v22 = vpop.trf.xlu0 }
  0xde   : > { %1081 = vmatmul.mubr.msk.f32.gmra.mrb[32].mxu0 %vm347_vm0, %v331_v22 }
  0xdf   : > { %610 = vmatprep.mubr.f32.mxu0 %v1317_v4 }
  0xe1   : > { %v332_v23 = vpop.trf.xlu0 }
  0xe2   : > { %1082 = vmatmul.mubr.msk.f32.gmra.mrb[34].mxu0 %vm347_vm0, %v332_v23 }
  0xe3   : > { %616 = vmatprep.mubr.f32.mxu0 %v1317_v4 }
  0xe5   : > { %v333_v24 = vpop.trf.xlu0 }
  0xe6   : > { %1083 = vmatmul.mubr.msk.f32.gmra.mrb[36].mxu0 %vm347_vm0, %v333_v24 }
  0xe7   : > { %622 = vmatprep.mubr.f32.mxu0 %v1317_v4 }
  0xe9   : > { %v334_v25 = vpop.trf.xlu0 }
  0xea   : > { %1084 = vmatmul.mubr.msk.f32.gmra.mrb[38].mxu0 %vm347_vm0, %v334_v25 }
  0xeb   : > { %628 = vmatprep.mubr.f32.mxu0 %v1317_v4 }
  0xed   : > { %v335_v26 = vpop.trf.xlu0 }
  0xee   : > { %1085 = vmatmul.mubr.msk.f32.gmra.mrb[40].mxu0 %vm347_vm0, %v335_v26 }
  0xef   : > { %634 = vmatprep.mubr.f32.mxu0 %v1317_v4 }
  0xf1   : > { %v336_v27 = vpop.trf.xlu0 }
  0xf2   : > { %1086 = vmatmul.mubr.msk.f32.gmra.mrb[42].mxu0 %vm347_vm0, %v336_v27 }
  0xf3   : > { %640 = vmatprep.mubr.f32.mxu0 %v1317_v4 }
  0xf5   : > { %v337_v28 = vpop.trf.xlu0 }
  0xf6   : > { %1087 = vmatmul.mubr.msk.f32.gmra.mrb[44].mxu0 %vm347_vm0, %v337_v28 }
  0xf7   : > { %646 = vmatprep.mubr.f32.mxu0 %v1317_v4 }
  0xf9   : > { %v338_v29 = vpop.trf.xlu0 }
  0xfa   : > { %1088 = vmatmul.mubr.msk.f32.gmra.mrb[46].mxu0 %vm347_vm0, %v338_v29 }
  0xfb   : > { %652 = vmatprep.mubr.f32.mxu0 %v1317_v4 }
  0xfd   : > { %v339_v30 = vpop.trf.xlu0 }
  0xfe   : > { %1089 = vmatmul.mubr.msk.f32.gmra.mrb[48].mxu0 %vm347_vm0, %v339_v30 }
  0xff   : > { %658 = vmatprep.mubr.f32.mxu0 %v1317_v4 }
 0x101   : > { %v340_v31 = vpop.trf.xlu0 }
 0x102   : > { %1090 = vmatmul.mubr.msk.f32.gmra.mrb[50].mxu0 %vm347_vm0, %v340_v31 }
 0x103   : > { %664 = vmatprep.mubr.f32.mxu0 %v1317_v4 }
 0x105   : > { %v341_v32 = vpop.trf.xlu0 }
 0x106   : > { %1091 = vmatmul.mubr.msk.f32.gmra.mrb[52].mxu0 %vm347_vm0, %v341_v32 }
 0x107   : > { %670 = vmatprep.mubr.f32.mxu0 %v1317_v4 }
 0x109   : > { %v342_v33 = vpop.trf.xlu0 }
 0x10a   : > { %1092 = vmatmul.mubr.msk.f32.gmra.mrb[54].mxu0 %vm347_vm0, %v342_v33 }
 0x10b   : > { %676 = vmatprep.mubr.f32.mxu0 %v1317_v4 }
 0x10d   : > { %v343_v34 = vpop.trf.xlu0 }
 0x10e   : > { %1093 = vmatmul.mubr.msk.f32.gmra.mrb[56].mxu0 %vm347_vm0, %v343_v34 }
 0x10f   : > { %682 = vmatprep.mubr.f32.mxu0 %v1317_v4 }
 0x111   : > { %v344_v35 = vpop.trf.xlu0 }
 0x112   : > { %1094 = vmatmul.mubr.msk.f32.gmra.mrb[58].mxu0 %vm347_vm0, %v344_v35 }
 0x113   : > { %688 = vmatprep.mubr.f32.mxu0 %v1317_v4 }
 0x115   : > { %v345_v36 = vpop.trf.xlu0 }
 0x116   : > { %1095 = vmatmul.mubr.msk.f32.gmra.mrb[60].mxu0 %vm347_vm0, %v345_v36 }
 0x117   : > { %694 = vmatprep.mubr.f32.mxu0 %v1317_v4 }
 0x119   : > { %v346_v37 = vpop.trf.xlu0 }
 0x11a   : > { %1096 = vmatmul.mubr.msk.f32.gmra.mrb[62].mxu0 %vm347_vm0, %v346_v37 }
 0x171   : > { %v510_v38 = vpop.f32.mrb[0].mxu0 }
 0x172   : > { %v701_v39 = vmul.f32 1.442695, %v510_v38  ;;  %v512_v40 = vpop.f32.mrb[1].mxu0 }
 0x173   : > { %v703_v41 = vmul.f32 1.442695, %v512_v40 }
 0x174   : > { %1146 = vpow2.f32 %v701_v39 }
 0x175   : > { %v516_v42 = vpop.f32.mrb[2].mxu0  ;;  %1148 = vpow2.f32 %v703_v41 }
 0x176   : > { %v705_v43 = vmul.f32 1.442695, %v516_v42  ;;  %v518_v44 = vpop.f32.mrb[3].mxu0 }
 0x177   : > { %v707_v45 = vmul.f32 1.442695, %v518_v44 }
 0x178   : > { %1150 = vpow2.f32 %v705_v43 }
 0x179   : > { %1152 = vpow2.f32 %v707_v45  ;;  %v522_v46 = vpop.f32.mrb[4].mxu0 }
 0x17a   : > { %v709_v47 = vmul.f32 1.442695, %v522_v46  ;;  %v524_v48 = vpop.f32.mrb[5].mxu0 }
 0x17b   : > { %v711_v49 = vmul.f32 1.442695, %v524_v48 }
 0x17c   : > { %1154 = vpow2.f32 %v709_v47 }
 0x17d   : > { %v528_v50 = vpop.f32.mrb[6].mxu0  ;;  %1156 = vpow2.f32 %v711_v49 }
 0x17e   : > { %v713_v51 = vmul.f32 1.442695, %v528_v50  ;;  %v530_v52 = vpop.f32.mrb[7].mxu0  ;;  %v1147_v56 = vpop.eup %1146 }
 0x17f   : > { %v715_v54 = vmul.f32 1.442695, %v530_v52  ;;  %v1149_v57 = vpop.eup %1148 }
 0x180   : > { %1158 = vpow2.f32 %v713_v51 }
 0x181   : > { %1160 = vpow2.f32 %v715_v54  ;;  %v534_v58 = vpop.f32.mrb[8].mxu0 }
 0x182   : > { %v1151_v59 = vpop.eup %1150  ;;  %v717_v60 = vmul.f32 1.442695, %v534_v58  ;;  %v536_v61 = vpop.f32.mrb[9].mxu0 }
 0x183   : > { %v1153_v62 = vpop.eup %1152  ;;  %v719_v63 = vmul.f32 1.442695, %v536_v61  ;;  %v829_v0 = vpack.c.bf16 %v1151_v59, %v1147_v56 }
 0x184   : > { %v830_v1 = vpack.c.bf16 %v1153_v62, %v1149_v57  ;;  %1162 = vpow2.f32 %v717_v60 }
 0x185   : > { %v540_v2 = vpop.f32.mrb[10].mxu0  ;;  %1164 = vpow2.f32 %v719_v63 }
 0x186   : > { %v721_v3 = vmul.f32 1.442695, %v540_v2  ;;  %v542_v4 = vpop.f32.mrb[11].mxu0  ;;  %871 = vmatprep.subr.bf16.mxu1 %v830_v1  ;;  %v1155_v6 = vpop.eup %1154 }
 0x187   : > { %v723_v5 = vmul.f32 1.442695, %v542_v4  ;;  %872 = vmatpush1.bf16.msra.mxu1 %v829_v0  ;;  %v1157_v7 = vpop.eup %1156 }
 0x188   : > { %1166 = vpow2.f32 %v721_v3 }
 0x189   : > { %1168 = vpow2.f32 %v723_v5  ;;  %v546_v8 = vpop.f32.mrb[12].mxu0 }
 0x18a   : > { %v1159_v9 = vpop.eup %1158  ;;  %v725_v10 = vmul.f32 1.442695, %v546_v8  ;;  %v548_v11 = vpop.f32.mrb[13].mxu0 }
 0x18b   : > { %v1161_v12 = vpop.eup %1160  ;;  %v727_v13 = vmul.f32 1.442695, %v548_v11  ;;  %v831_v14 = vpack.c.bf16 %v1159_v9, %v1155_v6 }
 0x18c   : > { %v832_v15 = vpack.c.bf16 %v1161_v12, %v1157_v7  ;;  %1170 = vpow2.f32 %v725_v10 }
 0x18d   : > { %v552_v16 = vpop.f32.mrb[14].mxu0  ;;  %1172 = vpow2.f32 %v727_v13 }
 0x18e   : > { %v729_v17 = vmul.f32 1.442695, %v552_v16  ;;  %v554_v18 = vpop.f32.mrb[15].mxu0  ;;  %873 = vmatprep.subr.bf16.mxu1 %v832_v15  ;;  %v1163_v20 = vpop.eup %1162 }
 0x18f   : > { %v731_v19 = vmul.f32 1.442695, %v554_v18  ;;  %874 = vmatpush1.bf16.msra.mxu1 %v831_v14  ;;  %v1165_v21 = vpop.eup %1164 }
 0x190   : > { %1174 = vpow2.f32 %v729_v17 }
 0x191   : > { %1176 = vpow2.f32 %v731_v19  ;;  %v558_v22 = vpop.f32.mrb[16].mxu0 }
 0x192   : > { %v1167_v23 = vpop.eup %1166  ;;  %v733_v24 = vmul.f32 1.442695, %v558_v22  ;;  %v560_v25 = vpop.f32.mrb[17].mxu0 }
 0x193   : > { %v1169_v26 = vpop.eup %1168  ;;  %v735_v27 = vmul.f32 1.442695, %v560_v25  ;;  %v833_v28 = vpack.c.bf16 %v1167_v23, %v1163_v20 }
 0x194   : > { %v834_v29 = vpack.c.bf16 %v1169_v26, %v1165_v21  ;;  %1178 = vpow2.f32 %v733_v24 }
 0x195   : > { %v564_v30 = vpop.f32.mrb[18].mxu0  ;;  %1180 = vpow2.f32 %v735_v27 }
 0x196   : > { %v737_v31 = vmul.f32 1.442695, %v564_v30  ;;  %v566_v32 = vpop.f32.mrb[19].mxu0  ;;  %875 = vmatprep.subr.bf16.mxu1 %v834_v29  ;;  %v1171_v34 = vpop.eup %1170 }
 0x197   : > { %v739_v33 = vmul.f32 1.442695, %v566_v32  ;;  %876 = vmatpush1.bf16.msra.mxu1 %v833_v28  ;;  %v1173_v35 = vpop.eup %1172 }
 0x198   : > { %1182 = vpow2.f32 %v737_v31 }
 0x199   : > { %1184 = vpow2.f32 %v739_v33  ;;  %v570_v36 = vpop.f32.mrb[20].mxu0 }
 0x19a   : > { %v1175_v37 = vpop.eup %1174  ;;  %v741_v38 = vmul.f32 1.442695, %v570_v36  ;;  %v572_v39 = vpop.f32.mrb[21].mxu0 }
 0x19b   : > { %v1177_v40 = vpop.eup %1176  ;;  %v743_v41 = vmul.f32 1.442695, %v572_v39  ;;  %v835_v42 = vpack.c.bf16 %v1175_v37, %v1171_v34 }
 0x19c   : > { %v836_v43 = vpack.c.bf16 %v1177_v40, %v1173_v35  ;;  %1186 = vpow2.f32 %v741_v38 }
 0x19d   : > { %v576_v44 = vpop.f32.mrb[22].mxu0  ;;  %1188 = vpow2.f32 %v743_v41 }
 0x19e   : > { %v745_v45 = vmul.f32 1.442695, %v576_v44  ;;  %v578_v46 = vpop.f32.mrb[23].mxu0  ;;  %877 = vmatprep.subr.bf16.mxu1 %v836_v43  ;;  %v1179_v48 = vpop.eup %1178 }
 0x19f   : > { %v747_v47 = vmul.f32 1.442695, %v578_v46  ;;  %878 = vmatpush1.bf16.msra.mxu1 %v835_v42  ;;  %v1181_v49 = vpop.eup %1180 }
 0x1a0   : > { %1190 = vpow2.f32 %v745_v45 }
 0x1a1   : > { %1192 = vpow2.f32 %v747_v47  ;;  %v582_v50 = vpop.f32.mrb[24].mxu0 }
 0x1a2   : > { %v1183_v51 = vpop.eup %1182  ;;  %v749_v52 = vmul.f32 1.442695, %v582_v50  ;;  %v584_v54 = vpop.f32.mrb[25].mxu0 }
 0x1a3   : > { %v1185_v55 = vpop.eup %1184  ;;  %v751_v56 = vmul.f32 1.442695, %v584_v54  ;;  %v837_v57 = vpack.c.bf16 %v1183_v51, %v1179_v48 }
 0x1a4   : > { %v838_v58 = vpack.c.bf16 %v1185_v55, %v1181_v49  ;;  %1194 = vpow2.f32 %v749_v52 }
 0x1a5   : > { %v588_v59 = vpop.f32.mrb[26].mxu0  ;;  %1196 = vpow2.f32 %v751_v56 }
 0x1a6   : > { %v753_v60 = vmul.f32 1.442695, %v588_v59  ;;  %v590_v61 = vpop.f32.mrb[27].mxu0  ;;  %879 = vmatprep.subr.bf16.mxu1 %v838_v58  ;;  %v1187_v63 = vpop.eup %1186 }
 0x1a7   : > { %v755_v62 = vmul.f32 1.442695, %v590_v61  ;;  %880 = vmatpush1.bf16.msra.mxu1 %v837_v57  ;;  %v1189_v0 = vpop.eup %1188 }
 0x1a8   : > { %1198 = vpow2.f32 %v753_v60 }
 0x1a9   : > { %1200 = vpow2.f32 %v755_v62  ;;  %v594_v1 = vpop.f32.mrb[28].mxu0 }
 0x1aa   : > { %v1191_v2 = vpop.eup %1190  ;;  %v757_v3 = vmul.f32 1.442695, %v594_v1  ;;  %v596_v4 = vpop.f32.mrb[29].mxu0 }
 0x1ab   : > { %v1193_v5 = vpop.eup %1192  ;;  %v759_v6 = vmul.f32 1.442695, %v596_v4  ;;  %v839_v7 = vpack.c.bf16 %v1191_v2, %v1187_v63 }
 0x1ac   : > { %v840_v8 = vpack.c.bf16 %v1193_v5, %v1189_v0  ;;  %1202 = vpow2.f32 %v757_v3 }
 0x1ad   : > { %v600_v9 = vpop.f32.mrb[30].mxu0  ;;  %1204 = vpow2.f32 %v759_v6 }
 0x1ae   : > { %v761_v10 = vmul.f32 1.442695, %v600_v9  ;;  %v602_v11 = vpop.f32.mrb[31].mxu0  ;;  %881 = vmatprep.subr.bf16.mxu1 %v840_v8  ;;  %v1195_v13 = vpop.eup %1194 }
 0x1af   : > { %v763_v12 = vmul.f32 1.442695, %v602_v11  ;;  %882 = vmatpush1.bf16.msra.mxu1 %v839_v7  ;;  %v1197_v14 = vpop.eup %1196 }
 0x1b0   : > { %1206 = vpow2.f32 %v761_v10 }
 0x1b1   : > { %1208 = vpow2.f32 %v763_v12  ;;  %v606_v15 = vpop.f32.mrb[32].mxu0 }
 0x1b2   : > { %v1199_v16 = vpop.eup %1198  ;;  %v765_v17 = vmul.f32 1.442695, %v606_v15  ;;  %v608_v18 = vpop.f32.mrb[33].mxu0 }
 0x1b3   : > { %v1201_v19 = vpop.eup %1200  ;;  %v767_v20 = vmul.f32 1.442695, %v608_v18  ;;  %v841_v21 = vpack.c.bf16 %v1199_v16, %v1195_v13 }
 0x1b4   : > { %v842_v22 = vpack.c.bf16 %v1201_v19, %v1197_v14  ;;  %1210 = vpow2.f32 %v765_v17 }
 0x1b5   : > { %v612_v23 = vpop.f32.mrb[34].mxu0  ;;  %1212 = vpow2.f32 %v767_v20 }
 0x1b6   : > { %v769_v24 = vmul.f32 1.442695, %v612_v23  ;;  %v614_v25 = vpop.f32.mrb[35].mxu0  ;;  %883 = vmatprep.subr.bf16.mxu1 %v842_v22  ;;  %v1203_v27 = vpop.eup %1202 }
 0x1b7   : > { %v771_v26 = vmul.f32 1.442695, %v614_v25  ;;  %884 = vmatpush1.bf16.msra.mxu1 %v841_v21  ;;  %v1205_v28 = vpop.eup %1204 }
 0x1b8   : > { %1214 = vpow2.f32 %v769_v24 }
 0x1b9   : > { %1216 = vpow2.f32 %v771_v26  ;;  %v618_v29 = vpop.f32.mrb[36].mxu0 }
 0x1ba   : > { %v1207_v30 = vpop.eup %1206  ;;  %v773_v31 = vmul.f32 1.442695, %v618_v29  ;;  %v620_v32 = vpop.f32.mrb[37].mxu0 }
 0x1bb   : > { %v1209_v33 = vpop.eup %1208  ;;  %v775_v34 = vmul.f32 1.442695, %v620_v32  ;;  %v843_v35 = vpack.c.bf16 %v1207_v30, %v1203_v27 }
 0x1bc   : > { %v844_v36 = vpack.c.bf16 %v1209_v33, %v1205_v28  ;;  %1218 = vpow2.f32 %v773_v31 }
 0x1bd   : > { %v624_v37 = vpop.f32.mrb[38].mxu0  ;;  %1220 = vpow2.f32 %v775_v34 }
 0x1be   : > { %v777_v38 = vmul.f32 1.442695, %v624_v37  ;;  %v626_v39 = vpop.f32.mrb[39].mxu0  ;;  %885 = vmatprep.subr.bf16.mxu1 %v844_v36  ;;  %v1211_v41 = vpop.eup %1210 }
 0x1bf   : > { %v779_v40 = vmul.f32 1.442695, %v626_v39  ;;  %886 = vmatpush1.bf16.msra.mxu1 %v843_v35  ;;  %v1213_v42 = vpop.eup %1212 }
 0x1c0   : > { %1222 = vpow2.f32 %v777_v38 }
 0x1c1   : > { %1224 = vpow2.f32 %v779_v40  ;;  %v630_v43 = vpop.f32.mrb[40].mxu0 }
 0x1c2   : > { %v1215_v44 = vpop.eup %1214  ;;  %v781_v45 = vmul.f32 1.442695, %v630_v43  ;;  %v632_v46 = vpop.f32.mrb[41].mxu0 }
 0x1c3   : > { %v1217_v47 = vpop.eup %1216  ;;  %v783_v48 = vmul.f32 1.442695, %v632_v46  ;;  %v845_v49 = vpack.c.bf16 %v1215_v44, %v1211_v41 }
 0x1c4   : > { %v846_v50 = vpack.c.bf16 %v1217_v47, %v1213_v42  ;;  %1226 = vpow2.f32 %v781_v45 }
 0x1c5   : > { %v636_v51 = vpop.f32.mrb[42].mxu0  ;;  %1228 = vpow2.f32 %v783_v48 }
 0x1c6   : > { %v785_v52 = vmul.f32 1.442695, %v636_v51  ;;  %v638_v54 = vpop.f32.mrb[43].mxu0  ;;  %887 = vmatprep.subr.bf16.mxu1 %v846_v50  ;;  %v1219_v56 = vpop.eup %1218 }
 0x1c7   : > { %v787_v55 = vmul.f32 1.442695, %v638_v54  ;;  %888 = vmatpush1.bf16.msra.mxu1 %v845_v49  ;;  %v1221_v57 = vpop.eup %1220 }
 0x1c8   : > { %1230 = vpow2.f32 %v785_v52 }
 0x1c9   : > { %1232 = vpow2.f32 %v787_v55  ;;  %v642_v58 = vpop.f32.mrb[44].mxu0 }
 0x1ca   : > { %v1223_v59 = vpop.eup %1222  ;;  %v789_v60 = vmul.f32 1.442695, %v642_v58  ;;  %v644_v61 = vpop.f32.mrb[45].mxu0 }
 0x1cb   : > { %v1225_v62 = vpop.eup %1224  ;;  %v791_v63 = vmul.f32 1.442695, %v644_v61  ;;  %v847_v0 = vpack.c.bf16 %v1223_v59, %v1219_v56 }
 0x1cc   : > { %v848_v1 = vpack.c.bf16 %v1225_v62, %v1221_v57  ;;  %1234 = vpow2.f32 %v789_v60 }
 0x1cd   : > { %v648_v2 = vpop.f32.mrb[46].mxu0  ;;  %1236 = vpow2.f32 %v791_v63 }
 0x1ce   : > { %v793_v3 = vmul.f32 1.442695, %v648_v2  ;;  %v650_v4 = vpop.f32.mrb[47].mxu0  ;;  %889 = vmatprep.subr.bf16.mxu1 %v848_v1  ;;  %v1227_v6 = vpop.eup %1226 }
 0x1cf   : > { %v795_v5 = vmul.f32 1.442695, %v650_v4  ;;  %890 = vmatpush1.bf16.msra.mxu1 %v847_v0  ;;  %v1229_v7 = vpop.eup %1228 }
 0x1d0   : > { %1238 = vpow2.f32 %v793_v3 }
 0x1d1   : > { %1240 = vpow2.f32 %v795_v5  ;;  %v654_v8 = vpop.f32.mrb[48].mxu0 }
 0x1d2   : > { %v1231_v9 = vpop.eup %1230  ;;  %v797_v10 = vmul.f32 1.442695, %v654_v8  ;;  %v656_v11 = vpop.f32.mrb[49].mxu0 }
 0x1d3   : > { %v1233_v12 = vpop.eup %1232  ;;  %v799_v13 = vmul.f32 1.442695, %v656_v11  ;;  %v849_v14 = vpack.c.bf16 %v1231_v9, %v1227_v6  ;;  %v1097_v11 = vcombine.low %v1456_v53, %v1456_v53  ;;  %v926_v53 = vlaneseq (!%p1099_p8) }
 0x1d4   : > { %v850_v15 = vpack.c.bf16 %v1233_v12, %v1229_v7  ;;  %1242 = vpow2.f32 %v797_v10  ;;  %v861_v12 = vld [vmem:[#allocation2] sm:$0xff] }
 0x1d5   : > { %v660_v16 = vpop.f32.mrb[50].mxu0  ;;  %1244 = vpow2.f32 %v799_v13  ;;  %v862_v13 = vld [vmem:[#allocation2 + $0x8] sm:$0xff]  ;;  %vm928_vm1 = vcmp.lt.s32.totalorder (!%p1099_p8), %v926_v53, 256 }
 0x1d6   : > { %v801_v17 = vmul.f32 1.442695, %v660_v16  ;;  %v662_v18 = vpop.f32.mrb[51].mxu0  ;;  %891 = vmatprep.subr.bf16.mxu1 %v850_v15  ;;  %v1235_v20 = vpop.eup %1234 }
 0x1d7   : > { %v803_v19 = vmul.f32 1.442695, %v662_v18  ;;  %892 = vmatpush1.bf16.msra.mxu1 %v849_v14  ;;  %v1237_v21 = vpop.eup %1236 }
 0x1d8   : > { %1246 = vpow2.f32 %v801_v17 }
 0x1d9   : > { %1248 = vpow2.f32 %v803_v19  ;;  %v666_v22 = vpop.f32.mrb[52].mxu0 }
 0x1da   : > { %v1239_v23 = vpop.eup %1238  ;;  %v805_v24 = vmul.f32 1.442695, %v666_v22  ;;  %v668_v25 = vpop.f32.mrb[53].mxu0 }
 0x1db   : > { %v1241_v26 = vpop.eup %1240  ;;  %v807_v27 = vmul.f32 1.442695, %v668_v25  ;;  %v851_v28 = vpack.c.bf16 %v1239_v23, %v1235_v20 }
 0x1dc   : > { %v852_v29 = vpack.c.bf16 %v1241_v26, %v1237_v21  ;;  %1250 = vpow2.f32 %v805_v24 }
 0x1dd   : > { %v672_v30 = vpop.f32.mrb[54].mxu0  ;;  %1252 = vpow2.f32 %v807_v27 }
 0x1de   : > { %v809_v31 = vmul.f32 1.442695, %v672_v30  ;;  %v674_v32 = vpop.f32.mrb[55].mxu0  ;;  %893 = vmatprep.subr.bf16.mxu1 %v852_v29  ;;  %v1243_v34 = vpop.eup %1242 }
 0x1df   : > { %v811_v33 = vmul.f32 1.442695, %v674_v32  ;;  %894 = vmatpush1.bf16.msra.mxu1 %v851_v28  ;;  %v1245_v35 = vpop.eup %1244 }
 0x1e0   : > { %1254 = vpow2.f32 %v809_v31 }
 0x1e1   : > { %1256 = vpow2.f32 %v811_v33  ;;  %v678_v36 = vpop.f32.mrb[56].mxu0 }
 0x1e2   : > { %v1247_v37 = vpop.eup %1246  ;;  %v813_v38 = vmul.f32 1.442695, %v678_v36  ;;  %v680_v39 = vpop.f32.mrb[57].mxu0 }
 0x1e3   : > { %v1249_v40 = vpop.eup %1248  ;;  %v815_v41 = vmul.f32 1.442695, %v680_v39  ;;  %v853_v42 = vpack.c.bf16 %v1247_v37, %v1243_v34 }
 0x1e4   : > { %v854_v43 = vpack.c.bf16 %v1249_v40, %v1245_v35  ;;  %1258 = vpow2.f32 %v813_v38 }
 0x1e5   : > { %v684_v44 = vpop.f32.mrb[58].mxu0  ;;  %1260 = vpow2.f32 %v815_v41 }
 0x1e6   : > { %v817_v45 = vmul.f32 1.442695, %v684_v44  ;;  %v686_v46 = vpop.f32.mrb[59].mxu0  ;;  %895 = vmatprep.subr.bf16.mxu1 %v854_v43  ;;  %v1251_v48 = vpop.eup %1250 }
 0x1e7   : > { %v819_v47 = vmul.f32 1.442695, %v686_v46  ;;  %896 = vmatpush1.bf16.msra.mxu1 %v853_v42  ;;  %v1253_v49 = vpop.eup %1252 }
 0x1e8   : > { %1262 = vpow2.f32 %v817_v45 }
 0x1e9   : > { %1264 = vpow2.f32 %v819_v47  ;;  %v690_v50 = vpop.f32.mrb[60].mxu0 }
 0x1ea   : > { %v1255_v51 = vpop.eup %1254  ;;  %v821_v52 = vmul.f32 1.442695, %v690_v50  ;;  %v692_v54 = vpop.f32.mrb[61].mxu0 }
 0x1eb   : > { %v1257_v55 = vpop.eup %1256  ;;  %v823_v56 = vmul.f32 1.442695, %v692_v54  ;;  %v855_v57 = vpack.c.bf16 %v1255_v51, %v1251_v48 }
 0x1ec   : > { %v856_v58 = vpack.c.bf16 %v1257_v55, %v1253_v49  ;;  %1266 = vpow2.f32 %v821_v52 }
 0x1ed   : > { %v696_v59 = vpop.f32.mrb[62].mxu0  ;;  %1268 = vpow2.f32 %v823_v56 }
 0x1ee   : > { %v825_v60 = vmul.f32 1.442695, %v696_v59  ;;  %v698_v61 = vpop.f32.mrb[63].mxu0  ;;  %897 = vmatprep.subr.bf16.mxu1 %v856_v58  ;;  %v1259_v63 = vpop.eup %1258 }
 0x1ef   : > { %v827_v62 = vmul.f32 1.442695, %v698_v61  ;;  %898 = vmatpush1.bf16.msra.mxu1 %v855_v57  ;;  %v1261_v0 = vpop.eup %1260 }
 0x1f0   : > { %1270 = vpow2.f32 %v825_v60 }
 0x1f1   : > { %1272 = vpow2.f32 %v827_v62 }
 0x1f2   : > { %v1263_v1 = vpop.eup %1262 }
 0x1f3   : > { %v1265_v2 = vpop.eup %1264  ;;  %v857_v3 = vpack.c.bf16 %v1263_v1, %v1259_v63 }
 0x1f4   : > { %v858_v4 = vpack.c.bf16 %v1265_v2, %v1261_v0 }
 0x1f6   : > { %899 = vmatprep.subr.bf16.mxu1 %v858_v4  ;;  %v1267_v5 = vpop.eup %1266 }
 0x1f7   : > { %900 = vmatpush1.bf16.msra.mxu1 %v857_v3  ;;  %v1269_v6 = vpop.eup %1268 }
 0x1fa   : > { %v1271_v7 = vpop.eup %1270 }
 0x1fb   : > { %v1273_v8 = vpop.eup %1272  ;;  %v859_v9 = vpack.c.bf16 %v1271_v7, %v1267_v5 }
 0x1fc   : > { %v860_v10 = vpack.c.bf16 %v1273_v8, %v1269_v6 }
 0x1fe   : > { %901 = vmatprep.subr.bf16.mxu1 %v860_v10 }
 0x1ff   : > { %902 = vmatpush1.bf16.msra.mxu1 %v859_v9 }
 0x202   : > { %904 = vmatmul.mubr.bf16.vlgmr.msra.gmra.mrb[0].mxu1 %v1097_v11 }
 0x2d3   : > { %919 = sbr.rel (%p1099_p8) target bundleno = 753 (0x2f1), region = 40 }
 0x2d5   : > { %v905_v14 = vpop.f32.mrb[0].mxu1 }
 0x2d6   : > { %v912_v15 = vadd.f32 %v905_v14, %v861_v12  ;;  %v907_v16 = vpop.f32.mrb[1].mxu1 }
 0x2d7   : > { %v913_v17 = vadd.f32 %v907_v16, %v862_v13  ;;  %v909_v18 = vpop.f32.mrb[2].mxu1 }
 0x2d8   : > { %914 = vst [vmem:[#allocation2] sm:$0xff] %v912_v15  ;;  %v910_v19 = vpop.f32.mrb[3].mxu1 }
 0x2d9   : > { %915 = vst [vmem:[#allocation2 + $0x8] sm:$0xff] %v913_v17 }
 0x2e0   : > { %v922_v20 = vld [vmem:[#allocation2 + $0x1] ss:$8 sm:$0x3]  ;;  %v920_v22 = vld [vmem:[#allocation2] ss:$8 sm:$0x3] }
 0x2e1   : > { %v923_v21 = vadd.f32 1e-06, %v922_v20 }
 0x2e3   : > { %1274 = vrcp.f32 %v923_v21 }
 0x2ed   : > { %v1275_v23 = vpop.eup %1274 }
 0x2ee   : > { %v925_v24 = vmul.f32 %v1275_v23, %v920_v22 }
 0x2f0   : > { %930 = vst.msk [vmem:[%s1374_s25] sm:$0x3] %vm928_vm1, %v925_v24 }
 0x2f1 PF: > { %s13_s16 = sadd.s32 1, %s1314_s16   ;;  %s1483_s12 = smov %s1306_s14 }
 0x2f2   : > { %p10_p9 = scmp.ge.s32.totalorder %s13_s16, 10   ;;  %s1484_s13 = smov %s1310_s15 }
 0x2f3   : > { %s1485_s14 = smov %s1488_s17  ;;  %s1486_s15 = smov %s1492_s18 }
 0x2f4   :  { %12 = sbr.rel (!%p10_p9) target bundleno = 3 (0x3), region = 77 }

</bundles_post_ra>
